<compile_context>
chip_gen: v7x
topology: tpu7x:2x2x1
jax: 0.10.0
libtpu: 0.0.40
codegen_flags: <defaults>
</compile_context>

<pallas_src>
import functools

import jax
import jax.numpy as jnp
from jax.experimental import pallas as pl
from jax.experimental.pallas import tpu as pltpu


# ---------------------------------------------------------------------------
# Fused kernel: in-VMEM im2col + one MXU matmul + bias + ReLU (one image/step)
# ---------------------------------------------------------------------------
def _fused_conv_relu_kernel(x_ref, w_ref, b_ref, o_ref, q_ref, *,
                            cin, ksize, width, n_cols):
    # x_ref: (1, Cin, H*W + K-1)   bf16  one image, flattened + margin pad
    # w_ref: (Cout, Cin*K*K)       bf16  columns ordered (kh, kw, ci)
    # b_ref: (Cout, 1)             f32
    # o_ref: (1, Cout, Ho*W)       f32
    # q_ref: (Cin*K*K, Ho*W)       bf16  VMEM scratch (im2col matrix)
    x = x_ref[0]                                        # (Cin, H*W + K-1)

    # Q[(kh*K + kw)*Cin + ci, oh*W + j] = x_flat[ci, (oh+kh)*W + (j+kw)].
    # For j < Wo this is exactly the conv patch element x[ci, oh+kh, j+kw];
    # columns j >= Wo are margin garbage that the caller slices off.  Every row
    # group is a *contiguous* lane slice of the flattened input, so only
    # static slices + stores are needed (no reshapes / transposes in-kernel).
    for kh in range(ksize):
        for kw in range(ksize):
            row = (kh * ksize + kw) * cin
            s = kh * width + kw
            q_ref[row:row + cin, :] = x[:, s:s + n_cols]

    # Single MXU matmul over the full contraction (Cin*K*K), f32 accumulation.
    acc = jnp.dot(w_ref[...], q_ref[...],
                  preferred_element_type=jnp.float32)    # (Cout, Ho*W)
    acc = acc + b_ref[...]                               # bias broadcast over lanes
    o_ref[0] = jnp.maximum(acc, 0.0).astype(o_ref.dtype)


# ---------------------------------------------------------------------------
# Wrapper: layout glue is all 1x-input-sized (no K^2 expansion in HBM)
# ---------------------------------------------------------------------------
@functools.partial(jax.jit, static_argnames=("kernel_size", "stride"))
def capsule_conv_forward(x, weight, bias, *, kernel_size=9, stride=1):
    """Forward pass of CapsuleConv: y = relu(conv2d(x, weight) + bias).

    x:      (N, Cin, H, W)     float32 (NCHW, as PyTorch)
    weight: (Cout, Cin, K, K)  float32 (PyTorch conv weight layout)
    bias:   (Cout,)            float32
    returns (N, Cout, Ho, Wo)  float32
    """
    assert stride == 1, "CapsuleConv default stride=1 is what we implement"
    n, cin, h, w = x.shape
    cout = weight.shape[0]
    k = kernel_size
    ho, wo = h - k + 1, w - k + 1
    n_cols = ho * w                 # full-width output columns (margin kept)
    hw_pad = h * w + (k - 1)        # flat input + margin so every slice is in-bounds
    r = cin * k * k                 # contraction dim (unpadded; Mosaic pads in VMEM)

    # Flattened input with a (K-1)-element zero margin; bf16 cast on 1x bytes.
    x_flat = jnp.pad(x.reshape(n, cin, h * w), ((0, 0), (0, 0), (0, k - 1)))
    x_flat = x_flat.astype(jnp.bfloat16)
    # Weight columns ordered (kh, kw, ci) to match the in-kernel Q row order.
    w_flat = weight.transpose(0, 2, 3, 1).reshape(cout, r).astype(jnp.bfloat16)
    b_col = bias.reshape(cout, 1).astype(jnp.float32)

    cost = pl.CostEstimate(
        flops=2 * n * cout * r * n_cols,
        transcendentals=0,
        bytes_accessed=(x_flat.size * 2 + w_flat.size * 2 + b_col.size * 4
                        + n * cout * n_cols * 4),
    )

    out = pl.pallas_call(
        functools.partial(_fused_conv_relu_kernel,
                          cin=cin, ksize=k, width=w, n_cols=n_cols),
        out_shape=jax.ShapeDtypeStruct((n, cout, n_cols), jnp.float32),
        grid_spec=pltpu.PrefetchScalarGridSpec(
            num_scalar_prefetch=0,
            grid=(n,),                                              # one image / step
            in_specs=[
                pl.BlockSpec((1, cin, hw_pad), lambda i: (i, 0, 0)),  # image slab
                pl.BlockSpec((cout, r), lambda i: (0, 0)),            # weight (resident)
                pl.BlockSpec((cout, 1), lambda i: (0, 0)),            # bias (resident)
            ],
            out_specs=pl.BlockSpec((1, cout, n_cols), lambda i: (i, 0, 0)),
            scratch_shapes=[pltpu.VMEM((r, n_cols), jnp.bfloat16)],   # im2col matrix
        ),
        compiler_params=pltpu.CompilerParams(
            dimension_semantics=("parallel",),   # batch axis shards across 2 TCs (v7x)
        ),
        cost_estimate=cost,
    )(x_flat, w_flat, b_col)

    # Channel-major already: NCHW is a free reshape + margin slice (no transpose).
    y = out.reshape(n, cout, ho, w)[:, :, :, :wo]
    return y


if __name__ == "__main__":
    # Small shapes consistent with CapsuleConv(kernel_size=9, stride=1):
    # spatial must be >= 9, so use 16x16 -> 8x8 output.
    N, CIN, H, W = 2, 4, 16, 16
    COUT, K = 8, 9

    key = jax.random.PRNGKey(0)
    kx, kw_, kb = jax.random.split(key, 3)
    x = jax.random.normal(kx, (N, CIN, H, W), dtype=jnp.float32)
    weight = jax.random.normal(kw_, (COUT, CIN, K, K), dtype=jnp.float32) * 0.05
    bias = jax.random.normal(kb, (COUT,), dtype=jnp.float32) * 0.05

    y = capsule_conv_forward(x, weight, bias, kernel_size=K, stride=1)
    y = jax.block_until_ready(y)
    assert y.shape == (N, COUT, H - K + 1, W - K + 1), y.shape

    # Reference: XLA conv + bias + ReLU on bf16-rounded operands (the kernel
    # feeds the MXU bf16 operands with f32 accumulation), so tolerance is tight.
    # (Accepted deviation vs. a pure-f32 PyTorch conv is ~1e-3 rel; see header.)
    x_bf = x.astype(jnp.bfloat16).astype(jnp.float32)
    w_bf = weight.astype(jnp.bfloat16).astype(jnp.float32)
    y_ref = jax.lax.conv_general_dilated(
        x_bf, w_bf, window_strides=(1, 1), padding="VALID",
        dimension_numbers=("NCHW", "OIHW", "NCHW"),
    ) + bias.reshape(1, COUT, 1, 1)
    y_ref = jnp.maximum(y_ref, 0.0)
    max_err = float(jnp.max(jnp.abs(y - y_ref)))
    assert jnp.allclose(y, y_ref, rtol=1e-3, atol=1e-4), max_err

    print("KERNEL_OK")
</pallas_src>

<mosaic_0001>
module attributes {stable_mosaic.version = 11 : i64} {
  func.func @_fused_conv_relu_kernel(%arg0: i32, %arg1: memref<1x4x264xbf16, #tpu.memory_space<vmem>>, %arg2: memref<8x324xbf16, #tpu.memory_space<vmem>>, %arg3: memref<8x1xf32, #tpu.memory_space<vmem>>, %arg4: memref<1x8x128xf32, #tpu.memory_space<vmem>>, %arg5: memref<324x128xbf16, #tpu.memory_space<vmem>>) attributes {dimension_semantics = [#tpu.dimension_semantics<parallel>], iteration_bounds = array<i64: 2>, scalar_prefetch = 0 : i64, scratch_operands = 1 : i64, tpu.core_type = #tpu.core_type<tc>, window_params = [{transform_indices = @transform_0, window_bounds = array<i64: 1, 4, 264>}, {pipeline_mode = #tpu.pipeline_mode<synchronous>, transform_indices = @transform_1, window_bounds = array<i64: 8, 324>}, {pipeline_mode = #tpu.pipeline_mode<synchronous>, transform_indices = @transform_2, window_bounds = array<i64: 8, 1>}, {transform_indices = @transform_3, window_bounds = array<i64: 1, 8, 128>}]} {
    %c0 = arith.constant 0 : index
    %c0_0 = arith.constant 0 : index
    %c0_1 = arith.constant 0 : index
    %0 = vector.load %arg1[%c0, %c0_0, %c0_1] : memref<1x4x264xbf16, #tpu.memory_space<vmem>>, vector<1x4x264xbf16>
    %1 = vector.shape_cast %0 : vector<1x4x264xbf16> to vector<4x264xbf16>
    %2 = vector.extract_strided_slice %1 {offsets = [0, 0], sizes = [4, 128], strides = [1, 1]} : vector<4x264xbf16> to vector<4x128xbf16>
    %c0_2 = arith.constant 0 : index
    %c0_3 = arith.constant 0 : index
    %3 = vector.load %arg5[%c0_2, %c0_3] : memref<324x128xbf16, #tpu.memory_space<vmem>>, vector<4x128xbf16>
    tpu.vector_store %arg5[%c0_2, %c0_3], %2 {strides = array<i32>} : memref<324x128xbf16, #tpu.memory_space<vmem>>, vector<4x128xbf16>,
    %4 = vector.extract_strided_slice %1 {offsets = [0, 1], sizes = [4, 128], strides = [1, 1]} : vector<4x264xbf16> to vector<4x128xbf16>
    %c4 = arith.constant 4 : index
    %c0_4 = arith.constant 0 : index
    %5 = vector.load %arg5[%c4, %c0_4] : memref<324x128xbf16, #tpu.memory_space<vmem>>, vector<4x128xbf16>
    tpu.vector_store %arg5[%c4, %c0_4], %4 {strides = array<i32>} : memref<324x128xbf16, #tpu.memory_space<vmem>>, vector<4x128xbf16>,
    %6 = vector.extract_strided_slice %1 {offsets = [0, 2], sizes = [4, 128], strides = [1, 1]} : vector<4x264xbf16> to vector<4x128xbf16>
    %c8 = arith.constant 8 : index
    %c0_5 = arith.constant 0 : index
    %7 = vector.load %arg5[%c8, %c0_5] : memref<324x128xbf16, #tpu.memory_space<vmem>>, vector<4x128xbf16>
    tpu.vector_store %arg5[%c8, %c0_5], %6 {strides = array<i32>} : memref<324x128xbf16, #tpu.memory_space<vmem>>, vector<4x128xbf16>,
    %8 = vector.extract_strided_slice %1 {offsets = [0, 3], sizes = [4, 128], strides = [1, 1]} : vector<4x264xbf16> to vector<4x128xbf16>
    %c12 = arith.constant 12 : index
    %c0_6 = arith.constant 0 : index
    %9 = vector.load %arg5[%c12, %c0_6] : memref<324x128xbf16, #tpu.memory_space<vmem>>, vector<4x128xbf16>
    tpu.vector_store %arg5[%c12, %c0_6], %8 {strides = array<i32>} : memref<324x128xbf16, #tpu.memory_space<vmem>>, vector<4x128xbf16>,
    %10 = vector.extract_strided_slice %1 {offsets = [0, 4], sizes = [4, 128], strides = [1, 1]} : vector<4x264xbf16> to vector<4x128xbf16>
    %c16 = arith.constant 16 : index
    %c0_7 = arith.constant 0 : index
    %11 = vector.load %arg5[%c16, %c0_7] : memref<324x128xbf16, #tpu.memory_space<vmem>>, vector<4x128xbf16>
    tpu.vector_store %arg5[%c16, %c0_7], %10 {strides = array<i32>} : memref<324x128xbf16, #tpu.memory_space<vmem>>, vector<4x128xbf16>,
    %12 = vector.extract_strided_slice %1 {offsets = [0, 5], sizes = [4, 128], strides = [1, 1]} : vector<4x264xbf16> to vector<4x128xbf16>
    %c20 = arith.constant 20 : index
    %c0_8 = arith.constant 0 : index
    %13 = vector.load %arg5[%c20, %c0_8] : memref<324x128xbf16, #tpu.memory_space<vmem>>, vector<4x128xbf16>
    tpu.vector_store %arg5[%c20, %c0_8], %12 {strides = array<i32>} : memref<324x128xbf16, #tpu.memory_space<vmem>>, vector<4x128xbf16>,
    %14 = vector.extract_strided_slice %1 {offsets = [0, 6], sizes = [4, 128], strides = [1, 1]} : vector<4x264xbf16> to vector<4x128xbf16>
    %c24 = arith.constant 24 : index
    %c0_9 = arith.constant 0 : index
    %15 = vector.load %arg5[%c24, %c0_9] : memref<324x128xbf16, #tpu.memory_space<vmem>>, vector<4x128xbf16>
    tpu.vector_store %arg5[%c24, %c0_9], %14 {strides = array<i32>} : memref<324x128xbf16, #tpu.memory_space<vmem>>, vector<4x128xbf16>,
    %16 = vector.extract_strided_slice %1 {offsets = [0, 7], sizes = [4, 128], strides = [1, 1]} : vector<4x264xbf16> to vector<4x128xbf16>
    %c28 = arith.constant 28 : index
    %c0_10 = arith.constant 0 : index
    %17 = vector.load %arg5[%c28, %c0_10] : memref<324x128xbf16, #tpu.memory_space<vmem>>, vector<4x128xbf16>
    tpu.vector_store %arg5[%c28, %c0_10], %16 {strides = array<i32>} : memref<324x128xbf16, #tpu.memory_space<vmem>>, vector<4x128xbf16>,
    %18 = vector.extract_strided_slice %1 {offsets = [0, 8], sizes = [4, 128], strides = [1, 1]} : vector<4x264xbf16> to vector<4x128xbf16>
    %c32 = arith.constant 32 : index
    %c0_11 = arith.constant 0 : index
    %19 = vector.load %arg5[%c32, %c0_11] : memref<324x128xbf16, #tpu.memory_space<vmem>>, vector<4x128xbf16>
    tpu.vector_store %arg5[%c32, %c0_11], %18 {strides = array<i32>} : memref<324x128xbf16, #tpu.memory_space<vmem>>, vector<4x128xbf16>,
    %20 = vector.extract_strided_slice %1 {offsets = [0, 16], sizes = [4, 128], strides = [1, 1]} : vector<4x264xbf16> to vector<4x128xbf16>
    %c36 = arith.constant 36 : index
    %c0_12 = arith.constant 0 : index
    %21 = vector.load %arg5[%c36, %c0_12] : memref<324x128xbf16, #tpu.memory_space<vmem>>, vector<4x128xbf16>
    tpu.vector_store %arg5[%c36, %c0_12], %20 {strides = array<i32>} : memref<324x128xbf16, #tpu.memory_space<vmem>>, vector<4x128xbf16>,
    %22 = vector.extract_strided_slice %1 {offsets = [0, 17], sizes = [4, 128], strides = [1, 1]} : vector<4x264xbf16> to vector<4x128xbf16>
    %c40 = arith.constant 40 : index
    %c0_13 = arith.constant 0 : index
    %23 = vector.load %arg5[%c40, %c0_13] : memref<324x128xbf16, #tpu.memory_space<vmem>>, vector<4x128xbf16>
    tpu.vector_store %arg5[%c40, %c0_13], %22 {strides = array<i32>} : memref<324x128xbf16, #tpu.memory_space<vmem>>, vector<4x128xbf16>,
    %24 = vector.extract_strided_slice %1 {offsets = [0, 18], sizes = [4, 128], strides = [1, 1]} : vector<4x264xbf16> to vector<4x128xbf16>
    %c44 = arith.constant 44 : index
    %c0_14 = arith.constant 0 : index
    %25 = vector.load %arg5[%c44, %c0_14] : memref<324x128xbf16, #tpu.memory_space<vmem>>, vector<4x128xbf16>
    tpu.vector_store %arg5[%c44, %c0_14], %24 {strides = array<i32>} : memref<324x128xbf16, #tpu.memory_space<vmem>>, vector<4x128xbf16>,
    %26 = vector.extract_strided_slice %1 {offsets = [0, 19], sizes = [4, 128], strides = [1, 1]} : vector<4x264xbf16> to vector<4x128xbf16>
    %c48 = arith.constant 48 : index
    %c0_15 = arith.constant 0 : index
    %27 = vector.load %arg5[%c48, %c0_15] : memref<324x128xbf16, #tpu.memory_space<vmem>>, vector<4x128xbf16>
    tpu.vector_store %arg5[%c48, %c0_15], %26 {strides = array<i32>} : memref<324x128xbf16, #tpu.memory_space<vmem>>, vector<4x128xbf16>,
    %28 = vector.extract_strided_slice %1 {offsets = [0, 20], sizes = [4, 128], strides = [1, 1]} : vector<4x264xbf16> to vector<4x128xbf16>
    %c52 = arith.constant 52 : index
    %c0_16 = arith.constant 0 : index
    %29 = vector.load %arg5[%c52, %c0_16] : memref<324x128xbf16, #tpu.memory_space<vmem>>, vector<4x128xbf16>
    tpu.vector_store %arg5[%c52, %c0_16], %28 {strides = array<i32>} : memref<324x128xbf16, #tpu.memory_space<vmem>>, vector<4x128xbf16>,
    %30 = vector.extract_strided_slice %1 {offsets = [0, 21], sizes = [4, 128], strides = [1, 1]} : vector<4x264xbf16> to vector<4x128xbf16>
    %c56 = arith.constant 56 : index
    %c0_17 = arith.constant 0 : index
    %31 = vector.load %arg5[%c56, %c0_17] : memref<324x128xbf16, #tpu.memory_space<vmem>>, vector<4x128xbf16>
    tpu.vector_store %arg5[%c56, %c0_17], %30 {strides = array<i32>} : memref<324x128xbf16, #tpu.memory_space<vmem>>, vector<4x128xbf16>,
    %32 = vector.extract_strided_slice %1 {offsets = [0, 22], sizes = [4, 128], strides = [1, 1]} : vector<4x264xbf16> to vector<4x128xbf16>
    %c60 = arith.constant 60 : index
    %c0_18 = arith.constant 0 : index
    %33 = vector.load %arg5[%c60, %c0_18] : memref<324x128xbf16, #tpu.memory_space<vmem>>, vector<4x128xbf16>
    tpu.vector_store %arg5[%c60, %c0_18], %32 {strides = array<i32>} : memref<324x128xbf16, #tpu.memory_space<vmem>>, vector<4x128xbf16>,
    %34 = vector.extract_strided_slice %1 {offsets = [0, 23], sizes = [4, 128], strides = [1, 1]} : vector<4x264xbf16> to vector<4x128xbf16>
    %c64 = arith.constant 64 : index
    %c0_19 = arith.constant 0 : index
    %35 = vector.load %arg5[%c64, %c0_19] : memref<324x128xbf16, #tpu.memory_space<vmem>>, vector<4x128xbf16>
    tpu.vector_store %arg5[%c64, %c0_19], %34 {strides = array<i32>} : memref<324x128xbf16, #tpu.memory_space<vmem>>, vector<4x128xbf16>,
    %36 = vector.extract_strided_slice %1 {offsets = [0, 24], sizes = [4, 128], strides = [1, 1]} : vector<4x264xbf16> to vector<4x128xbf16>
    %c68 = arith.constant 68 : index
    %c0_20 = arith.constant 0 : index
    %37 = vector.load %arg5[%c68, %c0_20] : memref<324x128xbf16, #tpu.memory_space<vmem>>, vector<4x128xbf16>
    tpu.vector_store %arg5[%c68, %c0_20], %36 {strides = array<i32>} : memref<324x128xbf16, #tpu.memory_space<vmem>>, vector<4x128xbf16>,
    %38 = vector.extract_strided_slice %1 {offsets = [0, 32], sizes = [4, 128], strides = [1, 1]} : vector<4x264xbf16> to vector<4x128xbf16>
    %c72 = arith.constant 72 : index
    %c0_21 = arith.constant 0 : index
    %39 = vector.load %arg5[%c72, %c0_21] : memref<324x128xbf16, #tpu.memory_space<vmem>>, vector<4x128xbf16>
    tpu.vector_store %arg5[%c72, %c0_21], %38 {strides = array<i32>} : memref<324x128xbf16, #tpu.memory_space<vmem>>, vector<4x128xbf16>,
    %40 = vector.extract_strided_slice %1 {offsets = [0, 33], sizes = [4, 128], strides = [1, 1]} : vector<4x264xbf16> to vector<4x128xbf16>
    %c76 = arith.constant 76 : index
    %c0_22 = arith.constant 0 : index
    %41 = vector.load %arg5[%c76, %c0_22] : memref<324x128xbf16, #tpu.memory_space<vmem>>, vector<4x128xbf16>
    tpu.vector_store %arg5[%c76, %c0_22], %40 {strides = array<i32>} : memref<324x128xbf16, #tpu.memory_space<vmem>>, vector<4x128xbf16>,
    %42 = vector.extract_strided_slice %1 {offsets = [0, 34], sizes = [4, 128], strides = [1, 1]} : vector<4x264xbf16> to vector<4x128xbf16>
    %c80 = arith.constant 80 : index
    %c0_23 = arith.constant 0 : index
    %43 = vector.load %arg5[%c80, %c0_23] : memref<324x128xbf16, #tpu.memory_space<vmem>>, vector<4x128xbf16>
    tpu.vector_store %arg5[%c80, %c0_23], %42 {strides = array<i32>} : memref<324x128xbf16, #tpu.memory_space<vmem>>, vector<4x128xbf16>,
    %44 = vector.extract_strided_slice %1 {offsets = [0, 35], sizes = [4, 128], strides = [1, 1]} : vector<4x264xbf16> to vector<4x128xbf16>
    %c84 = arith.constant 84 : index
    %c0_24 = arith.constant 0 : index
    %45 = vector.load %arg5[%c84, %c0_24] : memref<324x128xbf16, #tpu.memory_space<vmem>>, vector<4x128xbf16>
    tpu.vector_store %arg5[%c84, %c0_24], %44 {strides = array<i32>} : memref<324x128xbf16, #tpu.memory_space<vmem>>, vector<4x128xbf16>,
    %46 = vector.extract_strided_slice %1 {offsets = [0, 36], sizes = [4, 128], strides = [1, 1]} : vector<4x264xbf16> to vector<4x128xbf16>
    %c88 = arith.constant 88 : index
    %c0_25 = arith.constant 0 : index
    %47 = vector.load %arg5[%c88, %c0_25] : memref<324x128xbf16, #tpu.memory_space<vmem>>, vector<4x128xbf16>
    tpu.vector_store %arg5[%c88, %c0_25], %46 {strides = array<i32>} : memref<324x128xbf16, #tpu.memory_space<vmem>>, vector<4x128xbf16>,
    %48 = vector.extract_strided_slice %1 {offsets = [0, 37], sizes = [4, 128], strides = [1, 1]} : vector<4x264xbf16> to vector<4x128xbf16>
    %c92 = arith.constant 92 : index
    %c0_26 = arith.constant 0 : index
    %49 = vector.load %arg5[%c92, %c0_26] : memref<324x128xbf16, #tpu.memory_space<vmem>>, vector<4x128xbf16>
    tpu.vector_store %arg5[%c92, %c0_26], %48 {strides = array<i32>} : memref<324x128xbf16, #tpu.memory_space<vmem>>, vector<4x128xbf16>,
    %50 = vector.extract_strided_slice %1 {offsets = [0, 38], sizes = [4, 128], strides = [1, 1]} : vector<4x264xbf16> to vector<4x128xbf16>
    %c96 = arith.constant 96 : index
    %c0_27 = arith.constant 0 : index
    %51 = vector.load %arg5[%c96, %c0_27] : memref<324x128xbf16, #tpu.memory_space<vmem>>, vector<4x128xbf16>
    tpu.vector_store %arg5[%c96, %c0_27], %50 {strides = array<i32>} : memref<324x128xbf16, #tpu.memory_space<vmem>>, vector<4x128xbf16>,
    %52 = vector.extract_strided_slice %1 {offsets = [0, 39], sizes = [4, 128], strides = [1, 1]} : vector<4x264xbf16> to vector<4x128xbf16>
    %c100 = arith.constant 100 : index
    %c0_28 = arith.constant 0 : index
    %53 = vector.load %arg5[%c100, %c0_28] : memref<324x128xbf16, #tpu.memory_space<vmem>>, vector<4x128xbf16>
    tpu.vector_store %arg5[%c100, %c0_28], %52 {strides = array<i32>} : memref<324x128xbf16, #tpu.memory_space<vmem>>, vector<4x128xbf16>,
    %54 = vector.extract_strided_slice %1 {offsets = [0, 40], sizes = [4, 128], strides = [1, 1]} : vector<4x264xbf16> to vector<4x128xbf16>
    %c104 = arith.constant 104 : index
    %c0_29 = arith.constant 0 : index
    %55 = vector.load %arg5[%c104, %c0_29] : memref<324x128xbf16, #tpu.memory_space<vmem>>, vector<4x128xbf16>
    tpu.vector_store %arg5[%c104, %c0_29], %54 {strides = array<i32>} : memref<324x128xbf16, #tpu.memory_space<vmem>>, vector<4x128xbf16>,
    %56 = vector.extract_strided_slice %1 {offsets = [0, 48], sizes = [4, 128], strides = [1, 1]} : vector<4x264xbf16> to vector<4x128xbf16>
    %c108 = arith.constant 108 : index
    %c0_30 = arith.constant 0 : index
    %57 = vector.load %arg5[%c108, %c0_30] : memref<324x128xbf16, #tpu.memory_space<vmem>>, vector<4x128xbf16>
    tpu.vector_store %arg5[%c108, %c0_30], %56 {strides = array<i32>} : memref<324x128xbf16, #tpu.memory_space<vmem>>, vector<4x128xbf16>,
    %58 = vector.extract_strided_slice %1 {offsets = [0, 49], sizes = [4, 128], strides = [1, 1]} : vector<4x264xbf16> to vector<4x128xbf16>
    %c112 = arith.constant 112 : index
    %c0_31 = arith.constant 0 : index
    %59 = vector.load %arg5[%c112, %c0_31] : memref<324x128xbf16, #tpu.memory_space<vmem>>, vector<4x128xbf16>
    tpu.vector_store %arg5[%c112, %c0_31], %58 {strides = array<i32>} : memref<324x128xbf16, #tpu.memory_space<vmem>>, vector<4x128xbf16>,
    %60 = vector.extract_strided_slice %1 {offsets = [0, 50], sizes = [4, 128], strides = [1, 1]} : vector<4x264xbf16> to vector<4x128xbf16>
    %c116 = arith.constant 116 : index
    %c0_32 = arith.constant 0 : index
    %61 = vector.load %arg5[%c116, %c0_32] : memref<324x128xbf16, #tpu.memory_space<vmem>>, vector<4x128xbf16>
    tpu.vector_store %arg5[%c116, %c0_32], %60 {strides = array<i32>} : memref<324x128xbf16, #tpu.memory_space<vmem>>, vector<4x128xbf16>,
    %62 = vector.extract_strided_slice %1 {offsets = [0, 51], sizes = [4, 128], strides = [1, 1]} : vector<4x264xbf16> to vector<4x128xbf16>
    %c120 = arith.constant 120 : index
    %c0_33 = arith.constant 0 : index
    %63 = vector.load %arg5[%c120, %c0_33] : memref<324x128xbf16, #tpu.memory_space<vmem>>, vector<4x128xbf16>
    tpu.vector_store %arg5[%c120, %c0_33], %62 {strides = array<i32>} : memref<324x128xbf16, #tpu.memory_space<vmem>>, vector<4x128xbf16>,
    %64 = vector.extract_strided_slice %1 {offsets = [0, 52], sizes = [4, 128], strides = [1, 1]} : vector<4x264xbf16> to vector<4x128xbf16>
    %c124 = arith.constant 124 : index
    %c0_34 = arith.constant 0 : index
    %65 = vector.load %arg5[%c124, %c0_34] : memref<324x128xbf16, #tpu.memory_space<vmem>>, vector<4x128xbf16>
    tpu.vector_store %arg5[%c124, %c0_34], %64 {strides = array<i32>} : memref<324x128xbf16, #tpu.memory_space<vmem>>, vector<4x128xbf16>,
    %66 = vector.extract_strided_slice %1 {offsets = [0, 53], sizes = [4, 128], strides = [1, 1]} : vector<4x264xbf16> to vector<4x128xbf16>
    %c128 = arith.constant 128 : index
    %c0_35 = arith.constant 0 : index
    %67 = vector.load %arg5[%c128, %c0_35] : memref<324x128xbf16, #tpu.memory_space<vmem>>, vector<4x128xbf16>
    tpu.vector_store %arg5[%c128, %c0_35], %66 {strides = array<i32>} : memref<324x128xbf16, #tpu.memory_space<vmem>>, vector<4x128xbf16>,
    %68 = vector.extract_strided_slice %1 {offsets = [0, 54], sizes = [4, 128], strides = [1, 1]} : vector<4x264xbf16> to vector<4x128xbf16>
    %c132 = arith.constant 132 : index
    %c0_36 = arith.constant 0 : index
    %69 = vector.load %arg5[%c132, %c0_36] : memref<324x128xbf16, #tpu.memory_space<vmem>>, vector<4x128xbf16>
    tpu.vector_store %arg5[%c132, %c0_36], %68 {strides = array<i32>} : memref<324x128xbf16, #tpu.memory_space<vmem>>, vector<4x128xbf16>,
    %70 = vector.extract_strided_slice %1 {offsets = [0, 55], sizes = [4, 128], strides = [1, 1]} : vector<4x264xbf16> to vector<4x128xbf16>
    %c136 = arith.constant 136 : index
    %c0_37 = arith.constant 0 : index
    %71 = vector.load %arg5[%c136, %c0_37] : memref<324x128xbf16, #tpu.memory_space<vmem>>, vector<4x128xbf16>
    tpu.vector_store %arg5[%c136, %c0_37], %70 {strides = array<i32>} : memref<324x128xbf16, #tpu.memory_space<vmem>>, vector<4x128xbf16>,
    %72 = vector.extract_strided_slice %1 {offsets = [0, 56], sizes = [4, 128], strides = [1, 1]} : vector<4x264xbf16> to vector<4x128xbf16>
    %c140 = arith.constant 140 : index
    %c0_38 = arith.constant 0 : index
    %73 = vector.load %arg5[%c140, %c0_38] : memref<324x128xbf16, #tpu.memory_space<vmem>>, vector<4x128xbf16>
    tpu.vector_store %arg5[%c140, %c0_38], %72 {strides = array<i32>} : memref<324x128xbf16, #tpu.memory_space<vmem>>, vector<4x128xbf16>,
    %74 = vector.extract_strided_slice %1 {offsets = [0, 64], sizes = [4, 128], strides = [1, 1]} : vector<4x264xbf16> to vector<4x128xbf16>
    %c144 = arith.constant 144 : index
    %c0_39 = arith.constant 0 : index
    %75 = vector.load %arg5[%c144, %c0_39] : memref<324x128xbf16, #tpu.memory_space<vmem>>, vector<4x128xbf16>
    tpu.vector_store %arg5[%c144, %c0_39], %74 {strides = array<i32>} : memref<324x128xbf16, #tpu.memory_space<vmem>>, vector<4x128xbf16>,
    %76 = vector.extract_strided_slice %1 {offsets = [0, 65], sizes = [4, 128], strides = [1, 1]} : vector<4x264xbf16> to vector<4x128xbf16>
    %c148 = arith.constant 148 : index
    %c0_40 = arith.constant 0 : index
    %77 = vector.load %arg5[%c148, %c0_40] : memref<324x128xbf16, #tpu.memory_space<vmem>>, vector<4x128xbf16>
    tpu.vector_store %arg5[%c148, %c0_40], %76 {strides = array<i32>} : memref<324x128xbf16, #tpu.memory_space<vmem>>, vector<4x128xbf16>,
    %78 = vector.extract_strided_slice %1 {offsets = [0, 66], sizes = [4, 128], strides = [1, 1]} : vector<4x264xbf16> to vector<4x128xbf16>
    %c152 = arith.constant 152 : index
    %c0_41 = arith.constant 0 : index
    %79 = vector.load %arg5[%c152, %c0_41] : memref<324x128xbf16, #tpu.memory_space<vmem>>, vector<4x128xbf16>
    tpu.vector_store %arg5[%c152, %c0_41], %78 {strides = array<i32>} : memref<324x128xbf16, #tpu.memory_space<vmem>>, vector<4x128xbf16>,
    %80 = vector.extract_strided_slice %1 {offsets = [0, 67], sizes = [4, 128], strides = [1, 1]} : vector<4x264xbf16> to vector<4x128xbf16>
    %c156 = arith.constant 156 : index
    %c0_42 = arith.constant 0 : index
    %81 = vector.load %arg5[%c156, %c0_42] : memref<324x128xbf16, #tpu.memory_space<vmem>>, vector<4x128xbf16>
    tpu.vector_store %arg5[%c156, %c0_42], %80 {strides = array<i32>} : memref<324x128xbf16, #tpu.memory_space<vmem>>, vector<4x128xbf16>,
    %82 = vector.extract_strided_slice %1 {offsets = [0, 68], sizes = [4, 128], strides = [1, 1]} : vector<4x264xbf16> to vector<4x128xbf16>
    %c160 = arith.constant 160 : index
    %c0_43 = arith.constant 0 : index
    %83 = vector.load %arg5[%c160, %c0_43] : memref<324x128xbf16, #tpu.memory_space<vmem>>, vector<4x128xbf16>
    tpu.vector_store %arg5[%c160, %c0_43], %82 {strides = array<i32>} : memref<324x128xbf16, #tpu.memory_space<vmem>>, vector<4x128xbf16>,
    %84 = vector.extract_strided_slice %1 {offsets = [0, 69], sizes = [4, 128], strides = [1, 1]} : vector<4x264xbf16> to vector<4x128xbf16>
    %c164 = arith.constant 164 : index
    %c0_44 = arith.constant 0 : index
    %85 = vector.load %arg5[%c164, %c0_44] : memref<324x128xbf16, #tpu.memory_space<vmem>>, vector<4x128xbf16>
    tpu.vector_store %arg5[%c164, %c0_44], %84 {strides = array<i32>} : memref<324x128xbf16, #tpu.memory_space<vmem>>, vector<4x128xbf16>,
    %86 = vector.extract_strided_slice %1 {offsets = [0, 70], sizes = [4, 128], strides = [1, 1]} : vector<4x264xbf16> to vector<4x128xbf16>
    %c168 = arith.constant 168 : index
    %c0_45 = arith.constant 0 : index
    %87 = vector.load %arg5[%c168, %c0_45] : memref<324x128xbf16, #tpu.memory_space<vmem>>, vector<4x128xbf16>
    tpu.vector_store %arg5[%c168, %c0_45], %86 {strides = array<i32>} : memref<324x128xbf16, #tpu.memory_space<vmem>>, vector<4x128xbf16>,
    %88 = vector.extract_strided_slice %1 {offsets = [0, 71], sizes = [4, 128], strides = [1, 1]} : vector<4x264xbf16> to vector<4x128xbf16>
    %c172 = arith.constant 172 : index
    %c0_46 = arith.constant 0 : index
    %89 = vector.load %arg5[%c172, %c0_46] : memref<324x128xbf16, #tpu.memory_space<vmem>>, vector<4x128xbf16>
    tpu.vector_store %arg5[%c172, %c0_46], %88 {strides = array<i32>} : memref<324x128xbf16, #tpu.memory_space<vmem>>, vector<4x128xbf16>,
    %90 = vector.extract_strided_slice %1 {offsets = [0, 72], sizes = [4, 128], strides = [1, 1]} : vector<4x264xbf16> to vector<4x128xbf16>
    %c176 = arith.constant 176 : index
    %c0_47 = arith.constant 0 : index
    %91 = vector.load %arg5[%c176, %c0_47] : memref<324x128xbf16, #tpu.memory_space<vmem>>, vector<4x128xbf16>
    tpu.vector_store %arg5[%c176, %c0_47], %90 {strides = array<i32>} : memref<324x128xbf16, #tpu.memory_space<vmem>>, vector<4x128xbf16>,
    %92 = vector.extract_strided_slice %1 {offsets = [0, 80], sizes = [4, 128], strides = [1, 1]} : vector<4x264xbf16> to vector<4x128xbf16>
    %c180 = arith.constant 180 : index
    %c0_48 = arith.constant 0 : index
    %93 = vector.load %arg5[%c180, %c0_48] : memref<324x128xbf16, #tpu.memory_space<vmem>>, vector<4x128xbf16>
    tpu.vector_store %arg5[%c180, %c0_48], %92 {strides = array<i32>} : memref<324x128xbf16, #tpu.memory_space<vmem>>, vector<4x128xbf16>,
    %94 = vector.extract_strided_slice %1 {offsets = [0, 81], sizes = [4, 128], strides = [1, 1]} : vector<4x264xbf16> to vector<4x128xbf16>
    %c184 = arith.constant 184 : index
    %c0_49 = arith.constant 0 : index
    %95 = vector.load %arg5[%c184, %c0_49] : memref<324x128xbf16, #tpu.memory_space<vmem>>, vector<4x128xbf16>
    tpu.vector_store %arg5[%c184, %c0_49], %94 {strides = array<i32>} : memref<324x128xbf16, #tpu.memory_space<vmem>>, vector<4x128xbf16>,
    %96 = vector.extract_strided_slice %1 {offsets = [0, 82], sizes = [4, 128], strides = [1, 1]} : vector<4x264xbf16> to vector<4x128xbf16>
    %c188 = arith.constant 188 : index
    %c0_50 = arith.constant 0 : index
    %97 = vector.load %arg5[%c188, %c0_50] : memref<324x128xbf16, #tpu.memory_space<vmem>>, vector<4x128xbf16>
    tpu.vector_store %arg5[%c188, %c0_50], %96 {strides = array<i32>} : memref<324x128xbf16, #tpu.memory_space<vmem>>, vector<4x128xbf16>,
    %98 = vector.extract_strided_slice %1 {offsets = [0, 83], sizes = [4, 128], strides = [1, 1]} : vector<4x264xbf16> to vector<4x128xbf16>
    %c192 = arith.constant 192 : index
    %c0_51 = arith.constant 0 : index
    %99 = vector.load %arg5[%c192, %c0_51] : memref<324x128xbf16, #tpu.memory_space<vmem>>, vector<4x128xbf16>
    tpu.vector_store %arg5[%c192, %c0_51], %98 {strides = array<i32>} : memref<324x128xbf16, #tpu.memory_space<vmem>>, vector<4x128xbf16>,
    %100 = vector.extract_strided_slice %1 {offsets = [0, 84], sizes = [4, 128], strides = [1, 1]} : vector<4x264xbf16> to vector<4x128xbf16>
    %c196 = arith.constant 196 : index
    %c0_52 = arith.constant 0 : index
    %101 = vector.load %arg5[%c196, %c0_52] : memref<324x128xbf16, #tpu.memory_space<vmem>>, vector<4x128xbf16>
    tpu.vector_store %arg5[%c196, %c0_52], %100 {strides = array<i32>} : memref<324x128xbf16, #tpu.memory_space<vmem>>, vector<4x128xbf16>,
    %102 = vector.extract_strided_slice %1 {offsets = [0, 85], sizes = [4, 128], strides = [1, 1]} : vector<4x264xbf16> to vector<4x128xbf16>
    %c200 = arith.constant 200 : index
    %c0_53 = arith.constant 0 : index
    %103 = vector.load %arg5[%c200, %c0_53] : memref<324x128xbf16, #tpu.memory_space<vmem>>, vector<4x128xbf16>
    tpu.vector_store %arg5[%c200, %c0_53], %102 {strides = array<i32>} : memref<324x128xbf16, #tpu.memory_space<vmem>>, vector<4x128xbf16>,
    %104 = vector.extract_strided_slice %1 {offsets = [0, 86], sizes = [4, 128], strides = [1, 1]} : vector<4x264xbf16> to vector<4x128xbf16>
    %c204 = arith.constant 204 : index
    %c0_54 = arith.constant 0 : index
    %105 = vector.load %arg5[%c204, %c0_54] : memref<324x128xbf16, #tpu.memory_space<vmem>>, vector<4x128xbf16>
    tpu.vector_store %arg5[%c204, %c0_54], %104 {strides = array<i32>} : memref<324x128xbf16, #tpu.memory_space<vmem>>, vector<4x128xbf16>,
    %106 = vector.extract_strided_slice %1 {offsets = [0, 87], sizes = [4, 128], strides = [1, 1]} : vector<4x264xbf16> to vector<4x128xbf16>
    %c208 = arith.constant 208 : index
    %c0_55 = arith.constant 0 : index
    %107 = vector.load %arg5[%c208, %c0_55] : memref<324x128xbf16, #tpu.memory_space<vmem>>, vector<4x128xbf16>
    tpu.vector_store %arg5[%c208, %c0_55], %106 {strides = array<i32>} : memref<324x128xbf16, #tpu.memory_space<vmem>>, vector<4x128xbf16>,
    %108 = vector.extract_strided_slice %1 {offsets = [0, 88], sizes = [4, 128], strides = [1, 1]} : vector<4x264xbf16> to vector<4x128xbf16>
    %c212 = arith.constant 212 : index
    %c0_56 = arith.constant 0 : index
    %109 = vector.load %arg5[%c212, %c0_56] : memref<324x128xbf16, #tpu.memory_space<vmem>>, vector<4x128xbf16>
    tpu.vector_store %arg5[%c212, %c0_56], %108 {strides = array<i32>} : memref<324x128xbf16, #tpu.memory_space<vmem>>, vector<4x128xbf16>,
    %110 = vector.extract_strided_slice %1 {offsets = [0, 96], sizes = [4, 128], strides = [1, 1]} : vector<4x264xbf16> to vector<4x128xbf16>
    %c216 = arith.constant 216 : index
    %c0_57 = arith.constant 0 : index
    %111 = vector.load %arg5[%c216, %c0_57] : memref<324x128xbf16, #tpu.memory_space<vmem>>, vector<4x128xbf16>
    tpu.vector_store %arg5[%c216, %c0_57], %110 {strides = array<i32>} : memref<324x128xbf16, #tpu.memory_space<vmem>>, vector<4x128xbf16>,
    %112 = vector.extract_strided_slice %1 {offsets = [0, 97], sizes = [4, 128], strides = [1, 1]} : vector<4x264xbf16> to vector<4x128xbf16>
    %c220 = arith.constant 220 : index
    %c0_58 = arith.constant 0 : index
    %113 = vector.load %arg5[%c220, %c0_58] : memref<324x128xbf16, #tpu.memory_space<vmem>>, vector<4x128xbf16>
    tpu.vector_store %arg5[%c220, %c0_58], %112 {strides = array<i32>} : memref<324x128xbf16, #tpu.memory_space<vmem>>, vector<4x128xbf16>,
    %114 = vector.extract_strided_slice %1 {offsets = [0, 98], sizes = [4, 128], strides = [1, 1]} : vector<4x264xbf16> to vector<4x128xbf16>
    %c224 = arith.constant 224 : index
    %c0_59 = arith.constant 0 : index
    %115 = vector.load %arg5[%c224, %c0_59] : memref<324x128xbf16, #tpu.memory_space<vmem>>, vector<4x128xbf16>
    tpu.vector_store %arg5[%c224, %c0_59], %114 {strides = array<i32>} : memref<324x128xbf16, #tpu.memory_space<vmem>>, vector<4x128xbf16>,
    %116 = vector.extract_strided_slice %1 {offsets = [0, 99], sizes = [4, 128], strides = [1, 1]} : vector<4x264xbf16> to vector<4x128xbf16>
    %c228 = arith.constant 228 : index
    %c0_60 = arith.constant 0 : index
    %117 = vector.load %arg5[%c228, %c0_60] : memref<324x128xbf16, #tpu.memory_space<vmem>>, vector<4x128xbf16>
    tpu.vector_store %arg5[%c228, %c0_60], %116 {strides = array<i32>} : memref<324x128xbf16, #tpu.memory_space<vmem>>, vector<4x128xbf16>,
    %118 = vector.extract_strided_slice %1 {offsets = [0, 100], sizes = [4, 128], strides = [1, 1]} : vector<4x264xbf16> to vector<4x128xbf16>
    %c232 = arith.constant 232 : index
    %c0_61 = arith.constant 0 : index
    %119 = vector.load %arg5[%c232, %c0_61] : memref<324x128xbf16, #tpu.memory_space<vmem>>, vector<4x128xbf16>
    tpu.vector_store %arg5[%c232, %c0_61], %118 {strides = array<i32>} : memref<324x128xbf16, #tpu.memory_space<vmem>>, vector<4x128xbf16>,
    %120 = vector.extract_strided_slice %1 {offsets = [0, 101], sizes = [4, 128], strides = [1, 1]} : vector<4x264xbf16> to vector<4x128xbf16>
    %c236 = arith.constant 236 : index
    %c0_62 = arith.constant 0 : index
    %121 = vector.load %arg5[%c236, %c0_62] : memref<324x128xbf16, #tpu.memory_space<vmem>>, vector<4x128xbf16>
    tpu.vector_store %arg5[%c236, %c0_62], %120 {strides = array<i32>} : memref<324x128xbf16, #tpu.memory_space<vmem>>, vector<4x128xbf16>,
    %122 = vector.extract_strided_slice %1 {offsets = [0, 102], sizes = [4, 128], strides = [1, 1]} : vector<4x264xbf16> to vector<4x128xbf16>
    %c240 = arith.constant 240 : index
    %c0_63 = arith.constant 0 : index
    %123 = vector.load %arg5[%c240, %c0_63] : memref<324x128xbf16, #tpu.memory_space<vmem>>, vector<4x128xbf16>
    tpu.vector_store %arg5[%c240, %c0_63], %122 {strides = array<i32>} : memref<324x128xbf16, #tpu.memory_space<vmem>>, vector<4x128xbf16>,
    %124 = vector.extract_strided_slice %1 {offsets = [0, 103], sizes = [4, 128], strides = [1, 1]} : vector<4x264xbf16> to vector<4x128xbf16>
    %c244 = arith.constant 244 : index
    %c0_64 = arith.constant 0 : index
    %125 = vector.load %arg5[%c244, %c0_64] : memref<324x128xbf16, #tpu.memory_space<vmem>>, vector<4x128xbf16>
    tpu.vector_store %arg5[%c244, %c0_64], %124 {strides = array<i32>} : memref<324x128xbf16, #tpu.memory_space<vmem>>, vector<4x128xbf16>,
    %126 = vector.extract_strided_slice %1 {offsets = [0, 104], sizes = [4, 128], strides = [1, 1]} : vector<4x264xbf16> to vector<4x128xbf16>
    %c248 = arith.constant 248 : index
    %c0_65 = arith.constant 0 : index
    %127 = vector.load %arg5[%c248, %c0_65] : memref<324x128xbf16, #tpu.memory_space<vmem>>, vector<4x128xbf16>
    tpu.vector_store %arg5[%c248, %c0_65], %126 {strides = array<i32>} : memref<324x128xbf16, #tpu.memory_space<vmem>>, vector<4x128xbf16>,
    %128 = vector.extract_strided_slice %1 {offsets = [0, 112], sizes = [4, 128], strides = [1, 1]} : vector<4x264xbf16> to vector<4x128xbf16>
    %c252 = arith.constant 252 : index
    %c0_66 = arith.constant 0 : index
    %129 = vector.load %arg5[%c252, %c0_66] : memref<324x128xbf16, #tpu.memory_space<vmem>>, vector<4x128xbf16>
    tpu.vector_store %arg5[%c252, %c0_66], %128 {strides = array<i32>} : memref<324x128xbf16, #tpu.memory_space<vmem>>, vector<4x128xbf16>,
    %130 = vector.extract_strided_slice %1 {offsets = [0, 113], sizes = [4, 128], strides = [1, 1]} : vector<4x264xbf16> to vector<4x128xbf16>
    %c256 = arith.constant 256 : index
    %c0_67 = arith.constant 0 : index
    %131 = vector.load %arg5[%c256, %c0_67] : memref<324x128xbf16, #tpu.memory_space<vmem>>, vector<4x128xbf16>
    tpu.vector_store %arg5[%c256, %c0_67], %130 {strides = array<i32>} : memref<324x128xbf16, #tpu.memory_space<vmem>>, vector<4x128xbf16>,
    %132 = vector.extract_strided_slice %1 {offsets = [0, 114], sizes = [4, 128], strides = [1, 1]} : vector<4x264xbf16> to vector<4x128xbf16>
    %c260 = arith.constant 260 : index
    %c0_68 = arith.constant 0 : index
    %133 = vector.load %arg5[%c260, %c0_68] : memref<324x128xbf16, #tpu.memory_space<vmem>>, vector<4x128xbf16>
    tpu.vector_store %arg5[%c260, %c0_68], %132 {strides = array<i32>} : memref<324x128xbf16, #tpu.memory_space<vmem>>, vector<4x128xbf16>,
    %134 = vector.extract_strided_slice %1 {offsets = [0, 115], sizes = [4, 128], strides = [1, 1]} : vector<4x264xbf16> to vector<4x128xbf16>
    %c264 = arith.constant 264 : index
    %c0_69 = arith.constant 0 : index
    %135 = vector.load %arg5[%c264, %c0_69] : memref<324x128xbf16, #tpu.memory_space<vmem>>, vector<4x128xbf16>
    tpu.vector_store %arg5[%c264, %c0_69], %134 {strides = array<i32>} : memref<324x128xbf16, #tpu.memory_space<vmem>>, vector<4x128xbf16>,
    %136 = vector.extract_strided_slice %1 {offsets = [0, 116], sizes = [4, 128], strides = [1, 1]} : vector<4x264xbf16> to vector<4x128xbf16>
    %c268 = arith.constant 268 : index
    %c0_70 = arith.constant 0 : index
    %137 = vector.load %arg5[%c268, %c0_70] : memref<324x128xbf16, #tpu.memory_space<vmem>>, vector<4x128xbf16>
    tpu.vector_store %arg5[%c268, %c0_70], %136 {strides = array<i32>} : memref<324x128xbf16, #tpu.memory_space<vmem>>, vector<4x128xbf16>,
    %138 = vector.extract_strided_slice %1 {offsets = [0, 117], sizes = [4, 128], strides = [1, 1]} : vector<4x264xbf16> to vector<4x128xbf16>
    %c272 = arith.constant 272 : index
    %c0_71 = arith.constant 0 : index
    %139 = vector.load %arg5[%c272, %c0_71] : memref<324x128xbf16, #tpu.memory_space<vmem>>, vector<4x128xbf16>
    tpu.vector_store %arg5[%c272, %c0_71], %138 {strides = array<i32>} : memref<324x128xbf16, #tpu.memory_space<vmem>>, vector<4x128xbf16>,
    %140 = vector.extract_strided_slice %1 {offsets = [0, 118], sizes = [4, 128], strides = [1, 1]} : vector<4x264xbf16> to vector<4x128xbf16>
    %c276 = arith.constant 276 : index
    %c0_72 = arith.constant 0 : index
    %141 = vector.load %arg5[%c276, %c0_72] : memref<324x128xbf16, #tpu.memory_space<vmem>>, vector<4x128xbf16>
    tpu.vector_store %arg5[%c276, %c0_72], %140 {strides = array<i32>} : memref<324x128xbf16, #tpu.memory_space<vmem>>, vector<4x128xbf16>,
    %142 = vector.extract_strided_slice %1 {offsets = [0, 119], sizes = [4, 128], strides = [1, 1]} : vector<4x264xbf16> to vector<4x128xbf16>
    %c280 = arith.constant 280 : index
    %c0_73 = arith.constant 0 : index
    %143 = vector.load %arg5[%c280, %c0_73] : memref<324x128xbf16, #tpu.memory_space<vmem>>, vector<4x128xbf16>
    tpu.vector_store %arg5[%c280, %c0_73], %142 {strides = array<i32>} : memref<324x128xbf16, #tpu.memory_space<vmem>>, vector<4x128xbf16>,
    %144 = vector.extract_strided_slice %1 {offsets = [0, 120], sizes = [4, 128], strides = [1, 1]} : vector<4x264xbf16> to vector<4x128xbf16>
    %c284 = arith.constant 284 : index
    %c0_74 = arith.constant 0 : index
    %145 = vector.load %arg5[%c284, %c0_74] : memref<324x128xbf16, #tpu.memory_space<vmem>>, vector<4x128xbf16>
    tpu.vector_store %arg5[%c284, %c0_74], %144 {strides = array<i32>} : memref<324x128xbf16, #tpu.memory_space<vmem>>, vector<4x128xbf16>,
    %146 = vector.extract_strided_slice %1 {offsets = [0, 128], sizes = [4, 128], strides = [1, 1]} : vector<4x264xbf16> to vector<4x128xbf16>
    %c288 = arith.constant 288 : index
    %c0_75 = arith.constant 0 : index
    %147 = vector.load %arg5[%c288, %c0_75] : memref<324x128xbf16, #tpu.memory_space<vmem>>, vector<4x128xbf16>
    tpu.vector_store %arg5[%c288, %c0_75], %146 {strides = array<i32>} : memref<324x128xbf16, #tpu.memory_space<vmem>>, vector<4x128xbf16>,
    %148 = vector.extract_strided_slice %1 {offsets = [0, 129], sizes = [4, 128], strides = [1, 1]} : vector<4x264xbf16> to vector<4x128xbf16>
    %c292 = arith.constant 292 : index
    %c0_76 = arith.constant 0 : index
    %149 = vector.load %arg5[%c292, %c0_76] : memref<324x128xbf16, #tpu.memory_space<vmem>>, vector<4x128xbf16>
    tpu.vector_store %arg5[%c292, %c0_76], %148 {strides = array<i32>} : memref<324x128xbf16, #tpu.memory_space<vmem>>, vector<4x128xbf16>,
    %150 = vector.extract_strided_slice %1 {offsets = [0, 130], sizes = [4, 128], strides = [1, 1]} : vector<4x264xbf16> to vector<4x128xbf16>
    %c296 = arith.constant 296 : index
    %c0_77 = arith.constant 0 : index
    %151 = vector.load %arg5[%c296, %c0_77] : memref<324x128xbf16, #tpu.memory_space<vmem>>, vector<4x128xbf16>
    tpu.vector_store %arg5[%c296, %c0_77], %150 {strides = array<i32>} : memref<324x128xbf16, #tpu.memory_space<vmem>>, vector<4x128xbf16>,
    %152 = vector.extract_strided_slice %1 {offsets = [0, 131], sizes = [4, 128], strides = [1, 1]} : vector<4x264xbf16> to vector<4x128xbf16>
    %c300 = arith.constant 300 : index
    %c0_78 = arith.constant 0 : index
    %153 = vector.load %arg5[%c300, %c0_78] : memref<324x128xbf16, #tpu.memory_space<vmem>>, vector<4x128xbf16>
    tpu.vector_store %arg5[%c300, %c0_78], %152 {strides = array<i32>} : memref<324x128xbf16, #tpu.memory_space<vmem>>, vector<4x128xbf16>,
    %154 = vector.extract_strided_slice %1 {offsets = [0, 132], sizes = [4, 128], strides = [1, 1]} : vector<4x264xbf16> to vector<4x128xbf16>
    %c304 = arith.constant 304 : index
    %c0_79 = arith.constant 0 : index
    %155 = vector.load %arg5[%c304, %c0_79] : memref<324x128xbf16, #tpu.memory_space<vmem>>, vector<4x128xbf16>
    tpu.vector_store %arg5[%c304, %c0_79], %154 {strides = array<i32>} : memref<324x128xbf16, #tpu.memory_space<vmem>>, vector<4x128xbf16>,
    %156 = vector.extract_strided_slice %1 {offsets = [0, 133], sizes = [4, 128], strides = [1, 1]} : vector<4x264xbf16> to vector<4x128xbf16>
    %c308 = arith.constant 308 : index
    %c0_80 = arith.constant 0 : index
    %157 = vector.load %arg5[%c308, %c0_80] : memref<324x128xbf16, #tpu.memory_space<vmem>>, vector<4x128xbf16>
    tpu.vector_store %arg5[%c308, %c0_80], %156 {strides = array<i32>} : memref<324x128xbf16, #tpu.memory_space<vmem>>, vector<4x128xbf16>,
    %158 = vector.extract_strided_slice %1 {offsets = [0, 134], sizes = [4, 128], strides = [1, 1]} : vector<4x264xbf16> to vector<4x128xbf16>
    %c312 = arith.constant 312 : index
    %c0_81 = arith.constant 0 : index
    %159 = vector.load %arg5[%c312, %c0_81] : memref<324x128xbf16, #tpu.memory_space<vmem>>, vector<4x128xbf16>
    tpu.vector_store %arg5[%c312, %c0_81], %158 {strides = array<i32>} : memref<324x128xbf16, #tpu.memory_space<vmem>>, vector<4x128xbf16>,
    %160 = vector.extract_strided_slice %1 {offsets = [0, 135], sizes = [4, 128], strides = [1, 1]} : vector<4x264xbf16> to vector<4x128xbf16>
    %c316 = arith.constant 316 : index
    %c0_82 = arith.constant 0 : index
    %161 = vector.load %arg5[%c316, %c0_82] : memref<324x128xbf16, #tpu.memory_space<vmem>>, vector<4x128xbf16>
    tpu.vector_store %arg5[%c316, %c0_82], %160 {strides = array<i32>} : memref<324x128xbf16, #tpu.memory_space<vmem>>, vector<4x128xbf16>,
    %162 = vector.extract_strided_slice %1 {offsets = [0, 136], sizes = [4, 128], strides = [1, 1]} : vector<4x264xbf16> to vector<4x128xbf16>
    %c320 = arith.constant 320 : index
    %c0_83 = arith.constant 0 : index
    %163 = vector.load %arg5[%c320, %c0_83] : memref<324x128xbf16, #tpu.memory_space<vmem>>, vector<4x128xbf16>
    tpu.vector_store %arg5[%c320, %c0_83], %162 {strides = array<i32>} : memref<324x128xbf16, #tpu.memory_space<vmem>>, vector<4x128xbf16>,
    %c0_84 = arith.constant 0 : index
    %c0_85 = arith.constant 0 : index
    %164 = vector.load %arg2[%c0_84, %c0_85] : memref<8x324xbf16, #tpu.memory_space<vmem>>, vector<8x324xbf16>
    %c0_86 = arith.constant 0 : index
    %c0_87 = arith.constant 0 : index
    %165 = vector.load %arg5[%c0_86, %c0_87] : memref<324x128xbf16, #tpu.memory_space<vmem>>, vector<324x128xbf16>
    %cst = arith.constant dense<0.000000e+00> : vector<8x128xf32>
    %166 = tpu.matmul %164, %165, %cst {dimension_numbers = #tpu.dot_dimension_numbers<[1], [0], [0], [1], [0, 0, 1, 1], [], []>} : vector<8x324xbf16>, vector<324x128xbf16>, vector<8x128xf32> -> vector<8x128xf32>
    %c0_88 = arith.constant 0 : index
    %c0_89 = arith.constant 0 : index
    %167 = vector.load %arg3[%c0_88, %c0_89] : memref<8x1xf32, #tpu.memory_space<vmem>>, vector<8x1xf32>
    %168 = vector.broadcast %167 : vector<8x1xf32> to vector<8x128xf32>
    %169 = arith.addf %166, %168 : vector<8x128xf32>
    %cst_90 = arith.constant 0.000000e+00 : f32
    %170 = vector.broadcast %cst_90 : f32 to vector<8x128xf32>
    %171 = arith.maximumf %169, %170 : vector<8x128xf32>
    %c0_91 = arith.constant 0 : index
    %c0_92 = arith.constant 0 : index
    %c0_93 = arith.constant 0 : index
    %172 = vector.load %arg4[%c0_91, %c0_92, %c0_93] : memref<1x8x128xf32, #tpu.memory_space<vmem>>, vector<1x8x128xf32>
    %173 = vector.shape_cast %172 : vector<1x8x128xf32> to vector<8x128xf32>
    %174 = vector.shape_cast %171 : vector<8x128xf32> to vector<1x8x128xf32>
    tpu.vector_store %arg4[%c0_91, %c0_92, %c0_93], %174 {strides = array<i32>} : memref<1x8x128xf32, #tpu.memory_space<vmem>>, vector<1x8x128xf32>,
    return
  }
  func.func @transform_0(%arg0: i32) -> (i32, i32, i32) {
    %c0_i32 = arith.constant 0 : i32
    %c0_i32_0 = arith.constant 0 : i32
    %c0_i32_1 = arith.constant 0 : i32
    return %arg0, %c0_i32, %c0_i32_0 : i32, i32, i32
  }
  func.func @transform_1(%arg0: i32) -> (i32, i32) {
    %c0_i32 = arith.constant 0 : i32
    %c0_i32_0 = arith.constant 0 : i32
    %c0_i32_1 = arith.constant 0 : i32
    return %c0_i32, %c0_i32_0 : i32, i32
  }
  func.func @transform_2(%arg0: i32) -> (i32, i32) {
    %c0_i32 = arith.constant 0 : i32
    %c0_i32_0 = arith.constant 0 : i32
    %c0_i32_1 = arith.constant 0 : i32
    return %c0_i32, %c0_i32_0 : i32, i32
  }
  func.func @transform_3(%arg0: i32) -> (i32, i32, i32) {
    %c0_i32 = arith.constant 0 : i32
    %c0_i32_0 = arith.constant 0 : i32
    %c0_i32_1 = arith.constant 0 : i32
    return %arg0, %c0_i32, %c0_i32_0 : i32, i32, i32
  }
}

</mosaic_0001>

<bundles_post_ra>
// kernel: capsule_conv_forward.1
= control target key start
LH: loop header
LB: loop body
LE: loop exit
PB: predicated region body
PF: predicated region fallthrough
CT: control target
= control target key end

     0   :  { %s1352_s12 = smov 0   ;;  %s1576_s0 = inlined_call_operand.vmem [shape: bf16[2,4,264], index: 0, kind: input, shape index: {}]   ;;  %s1577_s1 = inlined_call_operand.vmem [shape: bf16[8,324], index: 1, kind: input, shape index: {}]   ;;  %s1578_s2 = inlined_call_operand.vmem [shape: f32[8,1], index: 2, kind: input, shape index: {}]   ;;  %s1579_s3 = inlined_call_operand.vmem [shape: f32[2,8,128], index: 3, kind: output, shape index: {}]  }
   0x1 LB: > { %s1061_s13 = sadd.s32 4294967295, %s1255_s12   ;;  %p1065_p0 = scmp.ge.s32.totalorder %s1255_s12, 1  ;;  %s1255_s12 = sphi %s1352_s12, %s13_s12  }
   0x2   : > { %p137_p1 = scmp.lt.s32.totalorder %s1255_s12, 3 }
   0x4   : > { %p138_p2 = pnand %p1065_p0, %p137_p1 }
   0x5   : > { %p160_p3 = scmp.lt.s32.totalorder (!%p138_p2), %s1061_s13, 1  ;;  %v177_v0 = vlaneseq (!%p138_p2)  ;;  %v1257_v1 = vmov (!%p138_p2), 1983009808   ;;  %s1258_s18 = smov (!%p138_p2), 73   ;;  %v1300_v12 = vmov (!%p138_p2), 0.0   ;;  %vm422_vm0 = vcmask (!%p138_p2), 596992  }
   0x6   : > { %141 = sbr.rel (%p138_p2) target bundleno = 521 (0x209), region = 32  ;;  %v175_v2 = vunpack.c.l.s4 (!%p138_p2), %v1257_v1  ;;  %s1259_s19 = smov (!%p138_p2), 75   ;;  %1123 = vmatprep.subr.bf16.mxu1 (!%p138_p2), %v1300_v12  ;;  %vm408_vm1 = vcmask (!%p138_p2), 613376   ;;  %vm198_vm2 = vcmask (!%p138_p2), 1031168   ;;  %vm415_vm3 = vcmask (!%p138_p2), 605184   ;;  %v1507_v62 = vld [vmem:[%s1577_s1] sm:$0xff] (!%p138_p2) }
   0x7   : > { %v178_v3 = vshrl.u32 (!%p138_p2), %v177_v0, 7  ;;  %s1260_s20 = smov (!%p138_p2), 126   ;;  %s1261_s21 = smov (!%p138_p2), 74   ;;  %vm436_vm4 = vcmask (!%p138_p2), 523264   ;;  %vm184_vm5 = vcmask (!%p138_p2), 1039360   ;;  %vm429_vm6 = vcmask (!%p138_p2), 588800  }
   0x8   : > { %v176_v4 = vunpack.c.0.s8 (!%p138_p2), %v175_v2  ;;  %s1262_s22 = smov (!%p138_p2), 64   ;;  %s1263_s23 = smov (!%p138_p2), 127   ;;  %vm205_vm7 = vcmask (!%p138_p2), 1022976   ;;  %vm450_vm8 = vcmask (!%p138_p2), 506880   ;;  %vm443_vm9 = vcmask (!%p138_p2), 515072  }
   0x9   : > { %s1264_s24 = smov (!%p138_p2), 72   ;;  %s1265_s25 = smov (!%p138_p2), 125   ;;  %vm212_vm10 = vcmask (!%p138_p2), 1014784   ;;  %vm457_vm11 = vcmask (!%p138_p2), 498688   ;;  %vm226_vm12 = vcmask (!%p138_p2), 998400   ;;  %vm219_vm13 = vcmask (!%p138_p2), 1006592  }
   0xa   : > { %v179_v5 = vsub.s32 (!%p138_p2), %v176_v4, %v178_v3  ;;  %s1266_s26 = smov (!%p138_p2), 62   ;;  %s1267_s27 = smov (!%p138_p2), 63   ;;  %vm464_vm14 = vcmask (!%p138_p2), 490496   ;;  %vm233_vm15 = vcmask (!%p138_p2), 990208   ;;  %v1069_v2 = vcombine.high (!%p138_p2), %v1507_v62, %v1507_v62 }
   0xb   : > { %s1268_s28 = smov (!%p138_p2), 124   ;;  %s1269_s29 = smov (!%p138_p2), 61  }
   0xc   : > { %s1270_s30 = smov (!%p138_p2), 122   ;;  %s1271_s4 = smov (!%p138_p2), 123   ;;  %958 = vmatprep.mubr.bf16.mxu0 (!%p138_p2), %v1069_v2 }
   0xd   : > { %s1581_s13 = smov (!%p160_p3, %s1061_s13), 1  ;;  %s1272_s5 = smov 60  }
   0xe   : > { %s1137_s14 = smul.u32 6, %s1581_s13  ;;  %s1273_s6 = smov 121  }
   0xf   : > { %s1274_s7 = smov 58   ;;  %s1275_s8 = smov 59  }
  0x10   : > { %s164_s17 = scalar_lea.vmem %s1576_s0, %s1137_s14  ;;  %s1276_s9 = smov 120  }
  0x11   : > { %v170_v6 = vld [vmem:[%s164_s17] sm:$0x3f]  ;;  %s1277_s10 = smov 57   ;;  %s1278_s11 = smov 111  }
  0x12   : > { %v1366_v7 = vrot.slane %v170_v6, %v179_v5  ;;  %171 = vst [vmem:[#allocation2] sm:$0x3] %v170_v6  ;;  %v173_v8 = vcombine.low %v170_v6, %v170_v6  ;;  %v693_v10 = vcombine.high %v170_v6, %v170_v6  ;;  %s1279_s14 = smov 112   ;;  %s1280_s15 = smov 56  }
  0x13   : > { %s1281_s16 = smov 110   ;;  %s1282_s17 = smov 47  }
  0x14   : > { %419 = vrot.lane.b32.xlu1 %v1366_v7, %s1258_s18  ;;  %405 = vrot.lane.b32.xlu0 %v1366_v7, %s1259_s19  ;;  %v1370_v9 = vrot.slane %v173_v8, %v179_v5  ;;  %v1375_v11 = vrot.slane %v693_v10, %v179_v5  ;;  %s1283_s18 = smov 48   ;;  %s1284_s19 = smov 109   ;;  %v685_v23 = vrot.slane %v1366_v7, 4 }
  0x16   : > { %687 = vst [vmem:[#allocation2 + $0x90] sm:$0x3] %v685_v23 }
  0x18   : > { %195 = vrot.lane.b32.xlu1 %v1366_v7, %s1260_s20  ;;  %412 = vrot.lane.b32.xlu0 %v1370_v9, %s1261_s21  ;;  %s1285_s21 = smov 46  }
  0x1c   : > { %433 = vrot.lane.b32.xlu1 %v1366_v7, %s1262_s22  ;;  %181 = vrot.lane.b32.xlu0 %v1370_v9, %s1263_s23  ;;  %s1286_s22 = smov 107  }
  0x20   : > { %426 = vrot.lane.b32.xlu1 %v1370_v9, %s1264_s24  ;;  %202 = vrot.lane.b32.xlu0 %v1370_v9, %s1265_s25  ;;  %s1287_s24 = smov 108  }
  0x24   : > { %447 = vrot.lane.b32.xlu1 %v1366_v7, %s1266_s26  ;;  %440 = vrot.lane.b32.xlu0 %v1370_v9, %s1267_s27  ;;  %s1288_s26 = smov 45   ;;  %s1289_s27 = smov 106  }
  0x28   : > { %209 = vrot.lane.b32.xlu1 %v1366_v7, %s1268_s28  ;;  %454 = vrot.lane.b32.xlu0 %v1370_v9, %s1269_s29  ;;  %s1290_s29 = smov 43  }
  0x2c   : > { %223 = vrot.lane.b32.xlu1 %v1366_v7, %s1270_s30  ;;  %216 = vrot.lane.b32.xlu0 %v1370_v9, %s1271_s4 }
  0x30   : > { %461 = vrot.lane.b32.xlu1 %v1366_v7, %s1272_s5  ;;  %230 = vrot.lane.b32.xlu0 %v1370_v9, %s1273_s6  ;;  %s1291_s5 = smov 44  }
  0x34   : > { %475 = vrot.lane.b32.xlu1 %v1366_v7, %s1274_s7  ;;  %468 = vrot.lane.b32.xlu0 %v1370_v9, %s1275_s8  ;;  %s1292_s7 = smov 105   ;;  %s1293_s8 = smov 42  }
  0x38   : > { %237 = vrot.lane.b32.xlu1 %v1366_v7, %s1276_s9  ;;  %482 = vrot.lane.b32.xlu0 %v1370_v9, %s1277_s10  ;;  %s1294_s10 = smov 96  }
  0x3c   : > { %251 = vrot.lane.b32.xlu1 %v1366_v7, %s1278_s11  ;;  %244 = vrot.lane.b32.xlu0 %v1370_v9, %s1279_s14  ;;  %s1295_s11 = smov 104   ;;  %s1296_s14 = smov 15  }
  0x40   : > { %489 = vrot.lane.b32.xlu1 %v1366_v7, %s1280_s15  ;;  %258 = vrot.lane.b32.xlu0 %v1370_v9, %s1281_s16  ;;  %s1297_s15 = smov 95   ;;  %s1298_s16 = smov 13  }
  0x44   : > { %503 = vrot.lane.b32.xlu1 %v1366_v7, %s1282_s17  ;;  %496 = vrot.lane.b32.xlu0 %v1370_v9, %s1283_s18  ;;  %s1299_s17 = smov 14   ;;  %s1301_s18 = smov 41  }
  0x48   : > { %265 = vrot.lane.b32.xlu1 %v1366_v7, %s1284_s19  ;;  %510 = vrot.lane.b32.xlu0 %v1370_v9, %s1285_s21  ;;  %s1302_s19 = smov 12   ;;  %s1303_s21 = smov 32  }
  0x4c   : > { %279 = vrot.lane.b32.xlu1 %v1366_v7, %s1286_s22  ;;  %272 = vrot.lane.b32.xlu0 %v1370_v9, %s1287_s24  ;;  %s1304_s22 = smov 40   ;;  %s1305_s24 = smov 94  }
  0x50   : > { %517 = vrot.lane.b32.xlu1 %v1366_v7, %s1288_s26  ;;  %286 = vrot.lane.b32.xlu0 %v1370_v9, %s1289_s27  ;;  %s1306_s26 = smov 31   ;;  %s1307_s27 = smov 92  }
  0x54   : > { %531 = vrot.lane.b32.xlu1 %v1366_v7, %s1290_s29  ;;  %524 = vrot.lane.b32.xlu0 %v1370_v9, %s1291_s5  ;;  %s1308_s29 = smov 93   ;;  %s1309_s5 = smov 11  }
  0x58   : > { %293 = vrot.lane.b32.xlu1 %v1366_v7, %s1292_s7  ;;  %538 = vrot.lane.b32.xlu0 %v1370_v9, %s1293_s8  ;;  %s1310_s7 = smov 91   ;;  %s1311_s8 = smov 9  }
  0x5c   : > { %307 = vrot.lane.b32.xlu1 %v1366_v7, %s1294_s10  ;;  %300 = vrot.lane.b32.xlu0 %v1370_v9, %s1295_s11  ;;  %s1312_s10 = smov 10   ;;  %s1313_s11 = smov 30  }
  0x60   : > { %629 = vrot.lane.b32.xlu1 %v1366_v7, %s1296_s14  ;;  %314 = vrot.lane.b32.xlu0 %v1370_v9, %s1297_s15  ;;  %s1314_s14 = smov 8   ;;  %s1315_s15 = smov 28  }
  0x64   : > { %643 = vrot.lane.b32.xlu1 %v1366_v7, %s1298_s16  ;;  %636 = vrot.lane.b32.xlu0 %v1370_v9, %s1299_s17  ;;  %s1316_s16 = smov 29   ;;  %s1317_s17 = smov 90  }
  0x68   : > { %545 = vrot.lane.b32.xlu1 %v1366_v7, %s1301_s18  ;;  %650 = vrot.lane.b32.xlu0 %v1370_v9, %s1302_s19  ;;  %s1318_s18 = smov 27   ;;  %s1319_s19 = smov 88  }
  0x6c   : > { %559 = vrot.lane.b32.xlu1 %v1366_v7, %s1303_s21  ;;  %552 = vrot.lane.b32.xlu0 %v1370_v9, %s1304_s22  ;;  %s1320_s21 = smov 89   ;;  %s1321_s22 = smov 26  }
  0x70   : > { %321 = vrot.lane.b32.xlu1 %v1366_v7, %s1305_s24  ;;  %566 = vrot.lane.b32.xlu0 %v1370_v9, %s1306_s26  ;;  %s1322_s24 = smov 80   ;;  %s1323_s26 = smov 24  }
  0x74   : > { %335 = vrot.lane.b32.xlu1 %v1366_v7, %s1307_s27  ;;  %328 = vrot.lane.b32.xlu0 %v1370_v9, %s1308_s29  ;;  %s1324_s27 = smov 25   ;;  %s1325_s29 = smov 16  }
  0x78   : > { %657 = vrot.lane.b32.xlu1 %v1366_v7, %s1309_s5  ;;  %342 = vrot.lane.b32.xlu0 %v1370_v9, %s1310_s7  ;;  %s1329_s5 = smov 77  }
  0x7c   : > { %671 = vrot.lane.b32.xlu1 %v1366_v7, %s1311_s8  ;;  %664 = vrot.lane.b32.xlu0 %v1370_v9, %s1312_s10 }
  0x80   : > { %573 = vrot.lane.b32.xlu1 %v1366_v7, %s1313_s11  ;;  %678 = vrot.lane.b32.xlu0 %v1370_v9, %s1314_s14 }
  0x84   : > { %587 = vrot.lane.b32.xlu1 %v1366_v7, %s1315_s15  ;;  %580 = vrot.lane.b32.xlu0 %v1370_v9, %s1316_s16 }
  0x86   : > { %v420_v13 = vpop.permute.xlu1 %419  ;;  %v406_v14 = vpop.permute.xlu0 %405 }
  0x87   : > { %v421_v15 = vrot.slane %v420_v13, 4  ;;  %v407_v16 = vrot.slane %v406_v14, 4 }
  0x88   : > { %349 = vrot.lane.b32.xlu1 %v1366_v7, %s1317_s17  ;;  %594 = vrot.lane.b32.xlu0 %v1370_v9, %s1318_s18 }
  0x89   : > { %v423_v17 = vsel %vm422_vm0, %v420_v13, %v421_v15  ;;  %v409_v18 = vsel %vm408_vm1, %v406_v14, %v407_v16  ;;  %vm478_vm0 = vcmask 474112   ;;  %vm471_vm1 = vcmask 482304  }
  0x8a   : > { %425 = vst [vmem:[#allocation2 + $0x44] sm:$0x3] %v423_v17  ;;  %411 = vst [vmem:[#allocation2 + $0x40] sm:$0x3] %v409_v18  ;;  %v1441_v19 = vpop.permute.xlu1 %195  ;;  %v413_v20 = vpop.permute.xlu0 %412 }
  0x8b   : > { %v197_v21 = vrot.slane %v1441_v19, 4  ;;  %v414_v22 = vrot.slane %v413_v20, 4 }
  0x8c   : > { %363 = vrot.lane.b32.xlu1 %v1366_v7, %s1319_s19  ;;  %356 = vrot.lane.b32.xlu0 %v1370_v9, %s1320_s21 }
  0x8d   : > { %v199_v24 = vsel %vm198_vm2, %v1441_v19, %v197_v21  ;;  %v416_v25 = vsel %vm415_vm3, %v413_v20, %v414_v22  ;;  %vm240_vm3 = vcmask 982016  }
  0x8e   : > { %201 = vst [vmem:[#allocation2 + $0x4] sm:$0x3] %v199_v24  ;;  %418 = vst [vmem:[#allocation2 + $0x40] sm:$0xc] %v416_v25  ;;  %v434_v26 = vpop.permute.xlu1 %433  ;;  %v1451_v27 = vpop.permute.xlu0 %181 }
  0x8f   : > { %v435_v28 = vrot.slane %v434_v26, 4  ;;  %v183_v29 = vrot.slane %v1451_v27, 4 }
  0x90   : > { %601 = vrot.lane.b32.xlu1 %v1366_v7, %s1321_s22  ;;  %370 = vrot.lane.b32.xlu0 %v1370_v9, %s1322_s24 }
  0x91   : > { %v437_v30 = vsel %vm436_vm4, %v434_v26, %v435_v28  ;;  %v185_v31 = vsel %vm184_vm5, %v1451_v27, %v183_v29  ;;  %vm485_vm4 = vcmask 465920   ;;  %v779_v26 = vld [vmem:[%s1578_s2] sm:$0xff] }
  0x92   : > { %439 = vst [vmem:[#allocation2 + $0x48] sm:$0x3] %v437_v30  ;;  %187 = vst [vmem:[#allocation2] sm:$0xc] %v185_v31  ;;  %v427_v32 = vpop.permute.xlu1 %426  ;;  %v1460_v33 = vpop.permute.xlu0 %202  ;;  %v1331_v31 = vmov 0  }
  0x93   : > { %v428_v34 = vrot.slane %v427_v32, 4  ;;  %v204_v35 = vrot.slane %v1460_v33, 4  ;;  %1221 = vset.pattern.permute.xlu1 %v1331_v31  ;;  %1222 = vset.pattern.permute.xlu0 %v1331_v31 }
  0x94   : > { %615 = vrot.lane.b32.xlu1 %v1366_v7, %s1323_s26  ;;  %608 = vrot.lane.b32.xlu0 %v1370_v9, %s1324_s27 }
  0x95   : > { %v430_v36 = vsel %vm429_vm6, %v427_v32, %v428_v34  ;;  %v206_v37 = vsel %vm205_vm7, %v1460_v33, %v204_v35  ;;  %vm254_vm6 = vcmask 908288  }
  0x96   : > { %432 = vst [vmem:[#allocation2 + $0x44] sm:$0xc] %v430_v36  ;;  %208 = vst [vmem:[#allocation2 + $0x4] sm:$0xc] %v206_v37  ;;  %v448_v38 = vpop.permute.xlu1 %447  ;;  %v441_v39 = vpop.permute.xlu0 %440 }
  0x97   : > { %v449_v40 = vrot.slane %v448_v38, 4  ;;  %v442_v41 = vrot.slane %v441_v39, 4 }
  0x98   : > { %688 = vrot.lane.b32.xlu1 %v1366_v7, %s1263_s23  ;;  %622 = vrot.lane.b32.xlu0 %v1370_v9, %s1325_s29  ;;  %s1327_s23 = smov 79  }
  0x99   : > { %v451_v42 = vsel %vm450_vm8, %v448_v38, %v449_v40  ;;  %v444_v43 = vsel %vm443_vm9, %v441_v39, %v442_v41  ;;  %vm247_vm8 = vcmask 916480   ;;  %vm1330_vm9 = vmmov 0  }
  0x9a   : > { %453 = vst [vmem:[#allocation2 + $0x4c] sm:$0x3] %v451_v42  ;;  %446 = vst [vmem:[#allocation2 + $0x48] sm:$0xc] %v444_v43  ;;  %v1472_v44 = vpop.permute.xlu1 %209  ;;  %v455_v45 = vpop.permute.xlu0 %454  ;;  %1133 = vmatprep.mubr.msk.bf16.mxu1 %vm1330_vm9, %v1300_v12  ;;  %vm275_vm9 = vcmask 883712  }
  0x9b   : > { %v211_v46 = vrot.slane %v1472_v44, 4  ;;  %v456_v47 = vrot.slane %v455_v45, 4 }
  0x9c   : > { %706 = vrot.lane.b32.xlu1 %v1366_v7, %s1265_s25  ;;  %701 = vrot.lane.b32.xlu0 %v1375_v11, %s1260_s20  ;;  %s1326_s20 = smov 78   ;;  %s1328_s25 = smov 76  }
  0x9d   : > { %v213_v48 = vsel %vm212_vm10, %v1472_v44, %v211_v46  ;;  %v458_v49 = vsel %vm457_vm11, %v455_v45, %v456_v47  ;;  %v1225_v50 = vld [vmem:[#allocation2 + $0x40] sm:$0xff]   ;;  %vm492_vm11 = vcmask 457728   ;;  %v1068_v44 = vcombine.low %v1507_v62, %v1507_v62 }
  0x9e   : > { %215 = vst [vmem:[#allocation2 + $0x8] sm:$0x3] %v213_v48  ;;  %460 = vst [vmem:[#allocation2 + $0x4c] sm:$0xc] %v458_v49  ;;  %v1483_v51 = vpop.permute.xlu1 %223  ;;  %v1485_v52 = vpop.permute.xlu0 %216  ;;  %v1226_v53 = vld [vmem:[#allocation2] sm:$0xff]   ;;  %1095 = vmatprep.subr.bf16.mxu0 %v1225_v50 }
  0x9f   : > { %v225_v54 = vrot.slane %v1483_v51, 4  ;;  %v218_v55 = vrot.slane %v1485_v52, 4  ;;  %1096 = vmatpush3.bf16.msra.mxu0 %v1226_v53 }
  0xa0   : > { %384 = vrot.lane.b32.xlu1 %v1370_v9, %s1326_s20  ;;  %377 = vrot.lane.b32.xlu0 %v1366_v7, %s1327_s23 }
  0xa1   : > { %v227_v56 = vsel %vm226_vm12, %v1483_v51, %v225_v54  ;;  %v220_v57 = vsel %vm219_vm13, %v1485_v52, %v218_v55 }
  0xa2   : > { %229 = vst [vmem:[#allocation2 + $0xc] sm:$0x3] %v227_v56  ;;  %222 = vst [vmem:[#allocation2 + $0x8] sm:$0xc] %v220_v57  ;;  %v462_v58 = vpop.permute.xlu1 %461  ;;  %v1499_v59 = vpop.permute.xlu0 %230 }
  0xa3   : > { %v463_v60 = vrot.slane %v462_v58, 4  ;;  %v232_v61 = vrot.slane %v1499_v59, 4 }
  0xa4   : > { %398 = vrot.lane.b32.xlu1 %v1370_v9, %s1328_s25  ;;  %391 = vrot.lane.b32.xlu0 %v1366_v7, %s1329_s5 }
  0xa5   : > { %v465_v63 = vsel %vm464_vm14, %v462_v58, %v463_v60  ;;  %v234_v0 = vsel %vm233_vm15, %v1499_v59, %v232_v61  ;;  %v1227_v1 = vld [vmem:[#allocation2 + $0x48] sm:$0xff]   ;;  %vm261_vm14 = vcmask 900096  }
  0xa6   : > { %467 = vst [vmem:[#allocation2 + $0x50] sm:$0x3] %v465_v63  ;;  %236 = vst [vmem:[#allocation2 + $0xc] sm:$0xc] %v234_v0  ;;  %v476_v3 = vpop.permute.xlu1 %475  ;;  %v469_v4 = vpop.permute.xlu0 %468  ;;  %1097 = vmatprep.subr.bf16.mxu0 %v1227_v1 }
  0xa7   : > { %v477_v5 = vrot.slane %v476_v3, 4  ;;  %v470_v6 = vrot.slane %v469_v4, 4 }
  0xa8   : > { %716 = vrot.lane.b32.xlu1 %v1366_v7, %s1271_s4  ;;  %711 = vrot.lane.b32.xlu0 %v1375_v11, %s1268_s28 }
  0xa9   : > { %v479_v8 = vsel %vm478_vm0, %v476_v3, %v477_v5  ;;  %v472_v9 = vsel %vm471_vm1, %v469_v4, %v470_v6  ;;  %vm506_vm0 = vcmask 384000   ;;  %vm499_vm1 = vcmask 392192  }
  0xaa   : > { %481 = vst [vmem:[#allocation2 + $0x54] sm:$0x3] %v479_v8  ;;  %474 = vst [vmem:[#allocation2 + $0x50] sm:$0xc] %v472_v9  ;;  %v1519_v10 = vpop.permute.xlu1 %237  ;;  %v483_v13 = vpop.permute.xlu0 %482 }
  0xab   : > { %v239_v14 = vrot.slane %v1519_v10, 4  ;;  %v484_v15 = vrot.slane %v483_v13, 4 }
  0xac   : > { %726 = vrot.lane.b32.xlu1 %v1366_v7, %s1273_s6  ;;  %721 = vrot.lane.b32.xlu0 %v1375_v11, %s1270_s30 }
  0xad   : > { %v241_v16 = vsel %vm240_vm3, %v1519_v10, %v239_v14  ;;  %v486_v17 = vsel %vm485_vm4, %v483_v13, %v484_v15  ;;  %v1228_v18 = vld [vmem:[#allocation2 + $0x8] sm:$0xff]   ;;  %vm268_vm4 = vcmask 891904  }
  0xae   : > { %243 = vst [vmem:[#allocation2 + $0x10] sm:$0x3] %v241_v16  ;;  %488 = vst [vmem:[#allocation2 + $0x54] sm:$0xc] %v486_v17  ;;  %v252_v20 = vpop.permute.xlu1 %251  ;;  %v245_v22 = vpop.permute.xlu0 %244  ;;  %1098 = vmatpush3.bf16.msra.mxu0 %v1228_v18 }
  0xaf   : > { %v253_v23 = vrot.slane %v252_v20, 4  ;;  %v246_v24 = vrot.slane %v245_v22, 4 }
  0xb0   : > { %731 = vrot.lane.b32.xlu0 %v1375_v11, %s1276_s9  ;;  %782 = vperm.xlu1 %1221, %v779_v26   ;;  %s1067_s9 = sshll.u32 %s1581_s13, 3 }
  0xb1   : > { %v255_v7 = vsel %vm254_vm6, %v252_v20, %v253_v23  ;;  %v248_v25 = vsel %vm247_vm8, %v245_v22, %v246_v24  ;;  %vm513_vm6 = vcmask 375808   ;;  %vm282_vm8 = vcmask 875520   ;;  %s168_s14 = scalar_lea.vmem %s1579_s3, %s1067_s9 }
  0xb2   : > { %257 = vst [vmem:[#allocation2 + $0x14] sm:$0x3] %v255_v7  ;;  %250 = vst [vmem:[#allocation2 + $0x10] sm:$0xc] %v248_v25  ;;  %v490_v28 = vpop.permute.xlu1 %489  ;;  %v259_v30 = vpop.permute.xlu0 %258 }
  0xb3   : > { %v491_v32 = vrot.slane %v490_v28, 4  ;;  %v260_v34 = vrot.slane %v259_v30, 4 }
  0xb5   : > { %v493_v36 = vsel %vm492_vm11, %v490_v28, %v491_v32  ;;  %v262_v11 = vsel %vm261_vm14, %v259_v30, %v260_v34  ;;  %v1229_v37 = vld [vmem:[#allocation2 + $0x50] sm:$0xff]   ;;  %vm520_vm11 = vcmask 367616   ;;  %vm289_vm14 = vcmask 867328  }
  0xb6   : > { %495 = vst [vmem:[#allocation2 + $0x58] sm:$0x3] %v493_v36  ;;  %264 = vst [vmem:[#allocation2 + $0x14] sm:$0xc] %v262_v11  ;;  %v504_v38 = vpop.permute.xlu1 %503  ;;  %v497_v39 = vpop.permute.xlu0 %496  ;;  %1099 = vmatprep.subr.bf16.mxu0 %v1229_v37 }
  0xb7   : > { %v505_v40 = vrot.slane %v504_v38, 4  ;;  %v498_v41 = vrot.slane %v497_v39, 4 }
  0xb9   : > { %v507_v42 = vsel %vm506_vm0, %v504_v38, %v505_v40  ;;  %v500_v43 = vsel %vm499_vm1, %v497_v39, %v498_v41  ;;  %vm534_vm0 = vcmask 351232   ;;  %vm527_vm1 = vcmask 359424  }
  0xba   : > { %509 = vst [vmem:[#allocation2 + $0x5c] sm:$0x3] %v507_v42  ;;  %502 = vst [vmem:[#allocation2 + $0x58] sm:$0xc] %v500_v43  ;;  %v266_v45 = vpop.permute.xlu1 %265  ;;  %v511_v47 = vpop.permute.xlu0 %510 }
  0xbb   : > { %v267_v48 = vrot.slane %v266_v45, 4  ;;  %v512_v49 = vrot.slane %v511_v47, 4 }
  0xbd   : > { %v269_v50 = vsel %vm268_vm4, %v266_v45, %v267_v48  ;;  %v514_v53 = vsel %vm513_vm6, %v511_v47, %v512_v49  ;;  %v1230_v56 = vld [vmem:[#allocation2 + $0x10] sm:$0xff]   ;;  %vm296_vm4 = vcmask 859136   ;;  %vm541_vm6 = vcmask 343040  }
  0xbe   : > { %271 = vst [vmem:[#allocation2 + $0x18] sm:$0x3] %v269_v50  ;;  %516 = vst [vmem:[#allocation2 + $0x5c] sm:$0xc] %v514_v53  ;;  %v280_v57 = vpop.permute.xlu1 %279  ;;  %v273_v58 = vpop.permute.xlu0 %272  ;;  %1100 = vmatpush3.bf16.msra.mxu0 %v1230_v56 }
  0xbf   : > { %v281_v60 = vrot.slane %v280_v57, 4  ;;  %v274_v63 = vrot.slane %v273_v58, 4 }
  0xc1   : > { %v283_v0 = vsel %vm282_vm8, %v280_v57, %v281_v60  ;;  %v276_v1 = vsel %vm275_vm9, %v273_v58, %v274_v63  ;;  %vm310_vm8 = vcmask 785408   ;;  %vm303_vm9 = vcmask 850944  }
  0xc2   : > { %285 = vst [vmem:[#allocation2 + $0x1c] sm:$0x3] %v283_v0  ;;  %278 = vst [vmem:[#allocation2 + $0x18] sm:$0xc] %v276_v1  ;;  %v518_v2 = vpop.permute.xlu1 %517  ;;  %v287_v3 = vpop.permute.xlu0 %286 }
  0xc3   : > { %v519_v4 = vrot.slane %v518_v2, 4  ;;  %v288_v5 = vrot.slane %v287_v3, 4 }
  0xc5   : > { %v521_v6 = vsel %vm520_vm11, %v518_v2, %v519_v4  ;;  %v290_v8 = vsel %vm289_vm14, %v287_v3, %v288_v5  ;;  %v1231_v9 = vld [vmem:[#allocation2 + $0x58] sm:$0xff]   ;;  %vm632_vm11 = vcmask 121856   ;;  %vm317_vm14 = vcmask 777216  }
  0xc6   : > { %523 = vst [vmem:[#allocation2 + $0x60] sm:$0x3] %v521_v6  ;;  %292 = vst [vmem:[#allocation2 + $0x1c] sm:$0xc] %v290_v8  ;;  %v532_v13 = vpop.permute.xlu1 %531  ;;  %v525_v15 = vpop.permute.xlu0 %524  ;;  %1101 = vmatprep.subr.bf16.mxu0 %v1231_v9 }
  0xc7   : > { %v533_v16 = vrot.slane %v532_v13, 4  ;;  %v526_v17 = vrot.slane %v525_v15, 4 }
  0xc9   : > { %v535_v18 = vsel %vm534_vm0, %v532_v13, %v533_v16  ;;  %v528_v20 = vsel %vm527_vm1, %v525_v15, %v526_v17  ;;  %vm646_vm0 = vcmask 105472   ;;  %vm639_vm1 = vcmask 113664  }
  0xca   : > { %537 = vst [vmem:[#allocation2 + $0x64] sm:$0x3] %v535_v18  ;;  %530 = vst [vmem:[#allocation2 + $0x60] sm:$0xc] %v528_v20  ;;  %v294_v22 = vpop.permute.xlu1 %293  ;;  %v539_v23 = vpop.permute.xlu0 %538 }
  0xcb   : > { %v295_v24 = vrot.slane %v294_v22, 4  ;;  %v540_v7 = vrot.slane %v539_v23, 4 }
  0xcd   : > { %v297_v25 = vsel %vm296_vm4, %v294_v22, %v295_v24  ;;  %v542_v26 = vsel %vm541_vm6, %v539_v23, %v540_v7  ;;  %v1232_v28 = vld [vmem:[#allocation2 + $0x18] sm:$0xff]   ;;  %vm548_vm4 = vcmask 334848   ;;  %vm653_vm6 = vcmask 97280  }
  0xce   : > { %299 = vst [vmem:[#allocation2 + $0x20] sm:$0x3] %v297_v25  ;;  %544 = vst [vmem:[#allocation2 + $0x64] sm:$0xc] %v542_v26  ;;  %v308_v30 = vpop.permute.xlu1 %307  ;;  %v301_v31 = vpop.permute.xlu0 %300  ;;  %1102 = vmatpush3.bf16.msra.mxu0 %v1232_v28 }
  0xcf   : > { %v309_v32 = vrot.slane %v308_v30, 4  ;;  %v302_v34 = vrot.slane %v301_v31, 4 }
  0xd1   : > { %v311_v36 = vsel %vm310_vm8, %v308_v30, %v309_v32  ;;  %v304_v11 = vsel %vm303_vm9, %v301_v31, %v302_v34  ;;  %vm562_vm8 = vcmask 261120   ;;  %vm555_vm9 = vcmask 326656  }
  0xd2   : > { %313 = vst [vmem:[#allocation2 + $0x24] sm:$0x3] %v311_v36  ;;  %306 = vst [vmem:[#allocation2 + $0x20] sm:$0xc] %v304_v11  ;;  %v630_v37 = vpop.permute.xlu1 %629  ;;  %v315_v38 = vpop.permute.xlu0 %314 }
  0xd3   : > { %v631_v39 = vrot.slane %v630_v37, 4  ;;  %v316_v40 = vrot.slane %v315_v38, 4 }
  0xd5   : > { %v633_v41 = vsel %vm632_vm11, %v630_v37, %v631_v39  ;;  %v318_v42 = vsel %vm317_vm14, %v315_v38, %v316_v40  ;;  %v1233_v43 = vld [vmem:[#allocation2 + $0x60] sm:$0xff]   ;;  %vm324_vm11 = vcmask 769024   ;;  %vm569_vm14 = vcmask 252928  }
  0xd6   : > { %635 = vst [vmem:[#allocation2 + $0x80] sm:$0x3] %v633_v41  ;;  %320 = vst [vmem:[#allocation2 + $0x24] sm:$0xc] %v318_v42  ;;  %v644_v45 = vpop.permute.xlu1 %643  ;;  %v637_v47 = vpop.permute.xlu0 %636  ;;  %1103 = vmatprep.subr.bf16.mxu0 %v1233_v43 }
  0xd7   : > { %v645_v48 = vrot.slane %v644_v45, 4  ;;  %v638_v49 = vrot.slane %v637_v47, 4 }
  0xd9   : > { %v647_v50 = vsel %vm646_vm0, %v644_v45, %v645_v48  ;;  %v640_v53 = vsel %vm639_vm1, %v637_v47, %v638_v49  ;;  %vm338_vm0 = vcmask 752640   ;;  %vm331_vm1 = vcmask 760832  }
  0xda   : > { %649 = vst [vmem:[#allocation2 + $0x84] sm:$0x3] %v647_v50  ;;  %642 = vst [vmem:[#allocation2 + $0x80] sm:$0xc] %v640_v53  ;;  %v546_v56 = vpop.permute.xlu1 %545  ;;  %v651_v57 = vpop.permute.xlu0 %650 }
  0xdb   : > { %v547_v58 = vrot.slane %v546_v56, 4  ;;  %v652_v60 = vrot.slane %v651_v57, 4 }
  0xdd   : > { %v549_v63 = vsel %vm548_vm4, %v546_v56, %v547_v58  ;;  %v654_v0 = vsel %vm653_vm6, %v651_v57, %v652_v60  ;;  %v1234_v1 = vld [vmem:[#allocation2 + $0x20] sm:$0xff]   ;;  %vm660_vm4 = vcmask 89088   ;;  %vm345_vm6 = vcmask 744448  }
  0xde   : > { %551 = vst [vmem:[#allocation2 + $0x68] sm:$0x3] %v549_v63  ;;  %656 = vst [vmem:[#allocation2 + $0x84] sm:$0xc] %v654_v0  ;;  %v560_v2 = vpop.permute.xlu1 %559  ;;  %v553_v3 = vpop.permute.xlu0 %552  ;;  %1104 = vmatpush3.bf16.msra.mxu0 %v1234_v1 }
  0xdf   : > { %v561_v4 = vrot.slane %v560_v2, 4  ;;  %v554_v5 = vrot.slane %v553_v3, 4 }
  0xe1   : > { %v563_v6 = vsel %vm562_vm8, %v560_v2, %v561_v4  ;;  %v556_v8 = vsel %vm555_vm9, %v553_v3, %v554_v5  ;;  %vm674_vm8 = vcmask 72704   ;;  %vm667_vm9 = vcmask 80896  }
  0xe2   : > { %565 = vst [vmem:[#allocation2 + $0x6c] sm:$0x3] %v563_v6  ;;  %558 = vst [vmem:[#allocation2 + $0x68] sm:$0xc] %v556_v8  ;;  %v322_v9 = vpop.permute.xlu1 %321  ;;  %v567_v13 = vpop.permute.xlu0 %566 }
  0xe3   : > { %v323_v15 = vrot.slane %v322_v9, 4  ;;  %v568_v16 = vrot.slane %v567_v13, 4 }
  0xe5   : > { %v325_v17 = vsel %vm324_vm11, %v322_v9, %v323_v15  ;;  %v570_v18 = vsel %vm569_vm14, %v567_v13, %v568_v16  ;;  %v1235_v20 = vld [vmem:[#allocation2 + $0x80] sm:$0xff]   ;;  %vm576_vm11 = vcmask 244736   ;;  %vm681_vm14 = vcmask 64512  }
  0xe6   : > { %327 = vst [vmem:[#allocation2 + $0x28] sm:$0x3] %v325_v17  ;;  %572 = vst [vmem:[#allocation2 + $0x6c] sm:$0xc] %v570_v18  ;;  %v336_v22 = vpop.permute.xlu1 %335  ;;  %v329_v23 = vpop.permute.xlu0 %328  ;;  %1124 = vmatpush3.bf16.msra.mxu1 %v1235_v20 }
  0xe7   : > { %v337_v24 = vrot.slane %v336_v22, 4  ;;  %v330_v7 = vrot.slane %v329_v23, 4  ;;  %1125 = vmatprep.subr.bf16.mxu1 %v1300_v12 }
  0xe9   : > { %v339_v25 = vsel %vm338_vm0, %v336_v22, %v337_v24  ;;  %v332_v26 = vsel %vm331_vm1, %v329_v23, %v330_v7  ;;  %vm590_vm0 = vcmask 228352   ;;  %vm583_vm1 = vcmask 236544  }
  0xea   : > { %341 = vst [vmem:[#allocation2 + $0x2c] sm:$0x3] %v339_v25  ;;  %334 = vst [vmem:[#allocation2 + $0x28] sm:$0xc] %v332_v26  ;;  %v658_v28 = vpop.permute.xlu1 %657  ;;  %v343_v30 = vpop.permute.xlu0 %342 }
  0xeb   : > { %v659_v31 = vrot.slane %v658_v28, 4  ;;  %v344_v32 = vrot.slane %v343_v30, 4 }
  0xed   : > { %v661_v34 = vsel %vm660_vm4, %v658_v28, %v659_v31  ;;  %v346_v36 = vsel %vm345_vm6, %v343_v30, %v344_v32  ;;  %v1236_v11 = vld [vmem:[#allocation2 + $0x68] sm:$0xff]   ;;  %vm352_vm4 = vcmask 736256   ;;  %vm597_vm6 = vcmask 220160  }
  0xee   : > { %663 = vst [vmem:[#allocation2 + $0x88] sm:$0x3] %v661_v34  ;;  %348 = vst [vmem:[#allocation2 + $0x2c] sm:$0xc] %v346_v36  ;;  %v672_v37 = vpop.permute.xlu1 %671  ;;  %v665_v38 = vpop.permute.xlu0 %664  ;;  %1105 = vmatprep.subr.bf16.mxu0 %v1236_v11 }
  0xef   : > { %v673_v39 = vrot.slane %v672_v37, 4  ;;  %v666_v40 = vrot.slane %v665_v38, 4 }
  0xf1   : > { %v675_v41 = vsel %vm674_vm8, %v672_v37, %v673_v39  ;;  %v668_v42 = vsel %vm667_vm9, %v665_v38, %v666_v40  ;;  %vm366_vm8 = vcmask 719872   ;;  %vm359_vm9 = vcmask 728064  }
  0xf2   : > { %677 = vst [vmem:[#allocation2 + $0x8c] sm:$0x3] %v675_v41  ;;  %670 = vst [vmem:[#allocation2 + $0x88] sm:$0xc] %v668_v42  ;;  %v574_v43 = vpop.permute.xlu1 %573  ;;  %v679_v45 = vpop.permute.xlu0 %678 }
  0xf3   : > { %v575_v47 = vrot.slane %v574_v43, 4  ;;  %v680_v48 = vrot.slane %v679_v45, 4 }
  0xf5   : > { %v577_v49 = vsel %vm576_vm11, %v574_v43, %v575_v47  ;;  %v682_v50 = vsel %vm681_vm14, %v679_v45, %v680_v48  ;;  %v1237_v53 = vld [vmem:[#allocation2 + $0x28] sm:$0xff]   ;;  %vm604_vm11 = vcmask 211968   ;;  %vm373_vm14 = vcmask 654336  }
  0xf6   : > { %579 = vst [vmem:[#allocation2 + $0x70] sm:$0x3] %v577_v49  ;;  %684 = vst [vmem:[#allocation2 + $0x8c] sm:$0xc] %v682_v50  ;;  %v588_v56 = vpop.permute.xlu1 %587  ;;  %v581_v57 = vpop.permute.xlu0 %580  ;;  %1106 = vmatpush3.bf16.msra.mxu0 %v1237_v53 }
  0xf7   : > { %v589_v58 = vrot.slane %v588_v56, 4  ;;  %v582_v60 = vrot.slane %v581_v57, 4 }
  0xf9   : > { %v591_v63 = vsel %vm590_vm0, %v588_v56, %v589_v58  ;;  %v584_v0 = vsel %vm583_vm1, %v581_v57, %v582_v60  ;;  %vm618_vm0 = vcmask 195584   ;;  %vm611_vm1 = vcmask 203776  }
  0xfa   : > { %593 = vst [vmem:[#allocation2 + $0x74] sm:$0x3] %v591_v63  ;;  %586 = vst [vmem:[#allocation2 + $0x70] sm:$0xc] %v584_v0  ;;  %v350_v1 = vpop.permute.xlu1 %349  ;;  %v595_v2 = vpop.permute.xlu0 %594 }
  0xfb   : > { %v351_v3 = vrot.slane %v350_v1, 4  ;;  %v596_v4 = vrot.slane %v595_v2, 4 }
  0xfd   : > { %v353_v5 = vsel %vm352_vm4, %v350_v1, %v351_v3  ;;  %v598_v6 = vsel %vm597_vm6, %v595_v2, %v596_v4  ;;  %v1238_v8 = vld [vmem:[#allocation2 + $0x88] sm:$0xff]   ;;  %vm625_vm4 = vcmask 130048   ;;  %vm387_vm6 = vcmask 637952  }
  0xfe   : > { %355 = vst [vmem:[#allocation2 + $0x30] sm:$0x3] %v353_v5  ;;  %600 = vst [vmem:[#allocation2 + $0x74] sm:$0xc] %v598_v6  ;;  %v364_v9 = vpop.permute.xlu1 %363  ;;  %v357_v13 = vpop.permute.xlu0 %356  ;;  %1126 = vmatpush3.bf16.msra.mxu1 %v1238_v8 }
  0xff   : > { %v365_v15 = vrot.slane %v364_v9, 4  ;;  %v358_v16 = vrot.slane %v357_v13, 4  ;;  %1127 = vmatprep.subr.bf16.mxu1 %v1300_v12 }
 0x101   : > { %v367_v17 = vsel %vm366_vm8, %v364_v9, %v365_v15  ;;  %v360_v18 = vsel %vm359_vm9, %v357_v13, %v358_v16  ;;  %vm401_vm8 = vcmask 621568  }
 0x102   : > { %369 = vst [vmem:[#allocation2 + $0x34] sm:$0x3] %v367_v17  ;;  %362 = vst [vmem:[#allocation2 + $0x30] sm:$0xc] %v360_v18  ;;  %v602_v20 = vpop.permute.xlu1 %601  ;;  %v371_v22 = vpop.permute.xlu0 %370 }
 0x103   : > { %v603_v23 = vrot.slane %v602_v20, 4  ;;  %v372_v24 = vrot.slane %v371_v22, 4 }
 0x105   : > { %v605_v7 = vsel %vm604_vm11, %v602_v20, %v603_v23  ;;  %v374_v25 = vsel %vm373_vm14, %v371_v22, %v372_v24  ;;  %v1239_v26 = vld [vmem:[#allocation2 + $0x70] sm:$0xff]  }
 0x106   : > { %607 = vst [vmem:[#allocation2 + $0x78] sm:$0x3] %v605_v7  ;;  %376 = vst [vmem:[#allocation2 + $0x34] sm:$0xc] %v374_v25  ;;  %v616_v28 = vpop.permute.xlu1 %615  ;;  %v609_v30 = vpop.permute.xlu0 %608  ;;  %1107 = vmatprep.subr.bf16.mxu0 %v1239_v26 }
 0x107   : > { %v617_v31 = vrot.slane %v616_v28, 4  ;;  %v610_v32 = vrot.slane %v609_v30, 4 }
 0x109   : > { %v619_v34 = vsel %vm618_vm0, %v616_v28, %v617_v31  ;;  %v612_v36 = vsel %vm611_vm1, %v609_v30, %v610_v32 }
 0x10a   : > { %621 = vst [vmem:[#allocation2 + $0x7c] sm:$0x3] %v619_v34  ;;  %614 = vst [vmem:[#allocation2 + $0x78] sm:$0xc] %v612_v36  ;;  %v689_v11 = vpop.permute.xlu1 %688  ;;  %v623_v37 = vpop.permute.xlu0 %622 }
 0x10b   : > { %v690_v38 = vsel %vm184_vm5, %v183_v29, %v689_v11  ;;  %v624_v39 = vrot.slane %v623_v37, 4  ;;  %vm380_vm5 = vcmask 646144  }
 0x10c   : > { %692 = vst [vmem:[#allocation2 + $0x90] sm:$0xc] %v690_v38 }
 0x10d   : > { %v626_v40 = vsel %vm625_vm4, %v623_v37, %v624_v39  ;;  %v1240_v41 = vld [vmem:[#allocation2 + $0x30] sm:$0xff]  }
 0x10e   : > { %628 = vst [vmem:[#allocation2 + $0x7c] sm:$0xc] %v626_v40  ;;  %v707_v42 = vpop.permute.xlu1 %706  ;;  %v702_v43 = vpop.permute.xlu0 %701  ;;  %1108 = vmatpush3.bf16.msra.mxu0 %v1240_v41 }
 0x10f   : > { %v708_v45 = vsel %vm205_vm7, %v204_v35, %v707_v42  ;;  %v703_v47 = vsel %vm198_vm2, %v197_v21, %v702_v43  ;;  %vm394_vm7 = vcmask 629760   ;;  %vm922_vm2 = vcmask 1041408  }
 0x110   : > { %710 = vst [vmem:[#allocation2 + $0x94] sm:$0xc] %v708_v45  ;;  %705 = vst [vmem:[#allocation2 + $0x94] sm:$0x3] %v703_v47 }
 0x112   : > { %v385_v27 = vpop.permute.xlu1 %384  ;;  %v378_v29 = vpop.permute.xlu0 %377 }
 0x113   : > { %v386_v48 = vrot.slane %v385_v27, 4  ;;  %v379_v49 = vrot.slane %v378_v29, 4 }
 0x115   : > { %v388_v50 = vsel %vm387_vm6, %v385_v27, %v386_v48  ;;  %v381_v53 = vsel %vm380_vm5, %v378_v29, %v379_v49  ;;  %v1241_v56 = vld [vmem:[#allocation2 + $0x78] sm:$0xff]  }
 0x116   : > { %390 = vst [vmem:[#allocation2 + $0x38] sm:$0xc] %v388_v50  ;;  %383 = vst [vmem:[#allocation2 + $0x38] sm:$0x3] %v381_v53  ;;  %v399_v33 = vpop.permute.xlu1 %398  ;;  %v392_v19 = vpop.permute.xlu0 %391  ;;  %1109 = vmatprep.subr.bf16.mxu0 %v1241_v56 }
 0x117   : > { %v400_v35 = vrot.slane %v399_v33, 4  ;;  %v393_v21 = vrot.slane %v392_v19, 4  ;;  %v1242_v57 = vld [vmem:[#allocation2 + $0x90] sm:$0xff]  }
 0x118   : > { %1128 = vmatpush3.bf16.msra.mxu1 %v1242_v57 }
 0x119   : > { %v402_v58 = vsel %vm401_vm8, %v399_v33, %v400_v35  ;;  %v395_v60 = vsel %vm394_vm7, %v392_v19, %v393_v21  ;;  %1129 = vmatprep.subr.bf16.mxu1 %v1300_v12 }
 0x11a   : > { %404 = vst [vmem:[#allocation2 + $0x3c] sm:$0xc] %v402_v58  ;;  %397 = vst [vmem:[#allocation2 + $0x3c] sm:$0x3] %v395_v60  ;;  %v717_v63 = vpop.permute.xlu1 %716  ;;  %v712_v0 = vpop.permute.xlu0 %711 }
 0x11b   : > { %v718_v1 = vsel %vm219_vm13, %v218_v55, %v717_v63  ;;  %v713_v2 = vsel %vm212_vm10, %v211_v46, %v712_v0  ;;  %vm918_vm10 = vcmask 556032  }
 0x11c   : > { %720 = vst [vmem:[#allocation2 + $0x98] sm:$0xc] %v718_v1  ;;  %715 = vst [vmem:[#allocation2 + $0x98] sm:$0x3] %v713_v2 }
 0x11e   : > { %v727_v3 = vpop.permute.xlu1 %726  ;;  %v722_v4 = vpop.permute.xlu0 %721 }
 0x11f   : > { %v728_v5 = vsel %vm233_vm15, %v232_v61, %v727_v3  ;;  %v723_v6 = vsel %vm226_vm12, %v225_v54, %v722_v4  ;;  %v1248_v61 = vld [vmem:[%s1577_s1 + $0x8] ss:$0 sps:$4 sm:$0xff]  }
 0x120   : > { %730 = vst [vmem:[#allocation2 + $0x9c] sm:$0xc] %v728_v5  ;;  %725 = vst [vmem:[#allocation2 + $0x9c] sm:$0x3] %v723_v6 }
 0x121   : > { %v1243_v52 = vld [vmem:[#allocation2 + $0x38] sm:$0xff]  }
 0x122   : > { %v732_v55 = vpop.permute.xlu0 %731  ;;  %1110 = vmatpush3.bf16.msra.mxu0 %v1243_v52 }
 0x123   : > { %v733_v46 = vsel %vm240_vm3, %v239_v14, %v732_v55 }
 0x124   : > { %735 = vst [vmem:[#allocation2 + $0xa0] sm:$0x3] %v733_v46 }
 0x125   : > { %959 = vmatmul.mubr.bf16.vlgmr.msra.gmra.mrb[0].mxu0 %v1068_v44 }
 0x127   : > { %v1246_v59 = vld [vmem:[#allocation2 + $0x98] sm:$0xff]  }
 0x128   : > { %1130 = vmatpush3.bf16.msra.mxu1 %v1246_v59 }
 0x129   : > { %1131 = vmatprep.subr.bf16.mxu1 %v1300_v12 }
 0x12b   : > { %v1247_v51 = vld [vmem:[#allocation2 + $0xa0] ss:$0 sps:$4 sm:$0x33]  }
 0x12c   : > { %v924_v54 = vsel %vm922_vm2, %v1247_v51, 0 }
 0x12d   : > { %1132 = vmatpush3.bf16.msra.mxu1 %v924_v54 }
 0x12f   : > { %v783_v13 = vpop.permute.xlu1 %782 }
 0x130   : > { %1134 = vmatmul.mubr.msk.bf16.vlgmr.msra.gmra.mrb[0].mxu1 %vm918_vm10, %v1248_v61 }
 0x1f8   : > { %v1111_v62 = vpop.f32.mrb[0].mxu0 }
 0x1f9   : > { %v1112_v10 = vpop.f32.mrb[1].mxu0 }
 0x1fa   : > { %v1113_v14 = vadd.f32 %v1112_v10, %v1111_v62  ;;  %v1114_v8 = vpop.f32.mrb[2].mxu0 }
 0x1fb   : > { %v1115_v9 = vpop.f32.mrb[3].mxu0 }
 0x1fc   : > { %v961_v15 = vadd.f32 %v1113_v14, %v783_v13 }
 0x203   : > { %v1000_v16 = vpop.f32.mrb[0].mxu1 }
 0x204   : > { %v1001_v12 = vadd.f32 %v1000_v16, %v961_v15  ;;  %v1135_v17 = vpop.f32.mrb[1].mxu1 }
 0x205   : > { %v1003_v18 = vpop.f32.mrb[2].mxu1 }
 0x206   : > { %v1006_v20 = vmax.f32 %v1001_v12, 0.0  ;;  %v1136_v22 = vpop.f32.mrb[3].mxu1 }
 0x208   : > { %1007 = vst [vmem:[%s168_s14] sm:$0xff] %v1006_v20 }
 0x209 PF: > { %s13_s12 = sadd.s32 1, %s1255_s12  }
 0x20a   : > { %p10_p4 = scmp.ge.s32.totalorder %s13_s12, 4  }
 0x20c   :  { %12 = sbr.rel (!%p10_p4) target bundleno = 1 (0x1), region = 62 }

</bundles_post_ra>
